<compile_context>
chip_gen: v7x
topology: tpu7x:2x2x1
jax: 0.10.0
libtpu: 0.0.40
codegen_flags: <defaults>
</compile_context>

<pallas_src>
import math

import jax
import jax.numpy as jnp
from jax.experimental import pallas as pl
from jax.experimental.pallas import tpu as pltpu


MXU_DTYPE = jnp.bfloat16      # MXU operand dtype (bf16 native rate on v5e/v6e/v7x)
PARAM_DTYPE = jnp.bfloat16    # weights shipped as bf16 -> half the HBM weight traffic


def _round_up(x, m):
    return ((x + m - 1) // m) * m


def _choose_tile(dim, desired, align):
    """Pick a tile (multiple of `align`, <= desired) and the padded dim it tiles.

    Prefers a divisor of the aligned dim (no padding beyond alignment); if only
    tiny divisors exist, pads the dim up to a multiple of the desired tile.
    """
    dim_a = _round_up(dim, align)
    t = min(desired, dim_a)
    t = max(align, (t // align) * align)
    if dim_a % t == 0:
        return t, dim_a
    d = t
    while d >= align and dim_a % d != 0:
        d -= align
    if d >= max(align, t // 2):
        return d, dim_a
    return t, _round_up(dim, t)


def _attn_tile(seq, desired):
    if seq % 8 != 0:
        # TODO(synk): masked remainder tiles for ragged sequence lengths.
        return seq
    t = max(8, (min(desired, seq) // 8) * 8)
    while seq % t != 0:
        t -= 8
    return t


def _hw_config():
    """VMEM-aware tile/limit defaults (v5e/v6e: 128 MiB VMEM; v7x: 64 MiB)."""
    try:
        vmem = getattr(pltpu.get_tpu_info(), "vmem_capacity_bytes", 0)
    except Exception:
        vmem = 0
    if vmem >= 100 * 1024 * 1024:
        return dict(tm=512, tn=1024, tk=512, vmem_limit=96 * 1024 * 1024)
    return dict(tm=256, tn=512, tk=512, vmem_limit=40 * 1024 * 1024)


_CFG = _hw_config()


# ---------------------------------------------------------------------------
# Fused tiled matmul:  x (M, K) @ w (K, N) + b (N,), optional exact erf-GELU.
# bf16 MXU operands, f32 accumulation; f32 outputs accumulate in o_ref directly.
# ---------------------------------------------------------------------------
def _make_linear_kernel(activation, mxu_dtype, acc_in_output):
    inv_sqrt2 = 1.0 / math.sqrt(2.0)

    def _epilogue(acc, b_ref, o_ref):
        y = acc + b_ref[...].astype(jnp.float32)
        if activation == "gelu":
            # exact GELU: x * 0.5 * (1 + erf(x / sqrt(2)))  (matches the module)
            y = y * 0.5 * (1.0 + jax.lax.erf(y * inv_sqrt2))
        o_ref[...] = y.astype(o_ref.dtype)

    if acc_in_output:
        def kernel(x_ref, w_ref, b_ref, o_ref):
            k = pl.program_id(2)

            @pl.when(k == 0)
            def _():
                o_ref[...] = jnp.zeros_like(o_ref)

            o_ref[...] += jnp.dot(x_ref[...].astype(mxu_dtype),
                                  w_ref[...].astype(mxu_dtype),
                                  preferred_element_type=jnp.float32)

            @pl.when(k == pl.num_programs(2) - 1)
            def _():
                _epilogue(o_ref[...], b_ref, o_ref)
    else:
        def kernel(x_ref, w_ref, b_ref, o_ref, acc_ref):
            k = pl.program_id(2)

            @pl.when(k == 0)
            def _():
                acc_ref[...] = jnp.zeros_like(acc_ref)

            acc_ref[...] += jnp.dot(x_ref[...].astype(mxu_dtype),
                                    w_ref[...].astype(mxu_dtype),
                                    preferred_element_type=jnp.float32)

            @pl.when(k == pl.num_programs(2) - 1)
            def _():
                _epilogue(acc_ref[...], b_ref, o_ref)

    return kernel


def linear_forward(x2d, weight, bias, activation=None,
                   tm=None, tn=None, tk=None, vmem_limit=None):
    M, K = x2d.shape
    Kw, N = weight.shape
    assert Kw == K
    tm = tm or _CFG["tm"]
    tn = tn or _CFG["tn"]
    tk = tk or _CFG["tk"]
    vmem_limit = vmem_limit or _CFG["vmem_limit"]

    tm, Mp = _choose_tile(M, tm, 8)
    tn, Np = _choose_tile(N, tn, 128)
    tk, Kp = _choose_tile(K, tk, 128)

    xp = x2d if (Mp, Kp) == (M, K) else jnp.pad(x2d, ((0, Mp - M), (0, Kp - K)))
    wp = weight if (Kp, Np) == (K, N) else jnp.pad(weight, ((0, Kp - K), (0, Np - N)))
    bp = bias if Np == N else jnp.pad(bias, (0, Np - N))

    out_dtype = x2d.dtype
    acc_in_output = jnp.dtype(out_dtype) == jnp.dtype(jnp.float32)
    grid = (Mp // tm, Np // tn, Kp // tk)

    cost = pl.CostEstimate(
        flops=2 * Mp * Np * Kp,
        transcendentals=(Mp * Np) if activation == "gelu" else 0,
        bytes_accessed=(Mp * Kp * xp.dtype.itemsize
                        + Kp * Np * wp.dtype.itemsize
                        + Np * 4
                        + Mp * Np * jnp.dtype(out_dtype).itemsize))

    out = pl.pallas_call(
        _make_linear_kernel(activation, MXU_DTYPE, acc_in_output),
        out_shape=jax.ShapeDtypeStruct((Mp, Np), out_dtype),
        grid_spec=pltpu.PrefetchScalarGridSpec(
            num_scalar_prefetch=0,
            grid=grid,
            in_specs=[
                pl.BlockSpec((tm, tk), lambda i, j, k: (i, k)),
                pl.BlockSpec((tk, tn), lambda i, j, k: (k, j)),
                pl.BlockSpec((1, tn), lambda i, j, k: (0, j)),
            ],
            out_specs=pl.BlockSpec((tm, tn), lambda i, j, k: (i, j)),
            scratch_shapes=([] if acc_in_output
                            else [pltpu.VMEM((tm, tn), jnp.float32)]),
        ),
        compiler_params=pltpu.CompilerParams(
            dimension_semantics=("parallel", "parallel", "arbitrary"),
            vmem_limit_bytes=vmem_limit),
        cost_estimate=cost,
    )(xp, wp, bp.reshape(1, Np))

    if (Mp, Np) != (M, N):
        out = out[:M, :N]
    return out


# ---------------------------------------------------------------------------
# Flash-style multi-head attention, reading Q/K/V directly out of the fused
# (B, S, 3H) projection slab via BlockSpec column slices (no HBM head split).
# ---------------------------------------------------------------------------
def _make_flash_attn_kernel(scale, mxu_dtype):
    def kernel(q_ref, k_ref, v_ref, o_ref, m_sc, l_sc, acc_sc):
        ki = pl.program_id(3)

        @pl.when(ki == 0)
        def _():
            m_sc[...] = jnp.full_like(m_sc, -jnp.inf)
            l_sc[...] = jnp.zeros_like(l_sc)
            acc_sc[...] = jnp.zeros_like(acc_sc)

        # Fold 1/sqrt(Dh) into q (O(tq*Dh) instead of O(tq*tk) work).
        q = (q_ref[...].astype(jnp.float32) * scale).astype(mxu_dtype)   # (tq, Dh)
        k = k_ref[...].astype(mxu_dtype)                                 # (tk, Dh)
        s = jax.lax.dot_general(q, k, (((1,), (1,)), ((), ())),
                                preferred_element_type=jnp.float32)      # (tq, tk)

        m_prev = m_sc[...]
        m_new = jnp.maximum(m_prev, jnp.max(s, axis=-1, keepdims=True))
        alpha = jnp.exp(m_prev - m_new)
        p = jnp.exp(s - m_new)
        l_sc[...] = alpha * l_sc[...] + jnp.sum(p, axis=-1, keepdims=True)
        acc_sc[...] = alpha * acc_sc[...] + jnp.dot(
            p.astype(mxu_dtype), v_ref[...].astype(mxu_dtype),
            preferred_element_type=jnp.float32)
        m_sc[...] = m_new

        @pl.when(ki == pl.num_programs(3) - 1)
        def _():
            inv_l = pl.reciprocal(l_sc[...], approx=True)   # EUP slot, not VALU
            o_ref[...] = (acc_sc[...] * inv_l).astype(o_ref.dtype)

    return kernel


def attention_from_qkv(qkv2d, B, S, nH, tq=256, tk=512):
    """softmax(Q K^T / sqrt(Dh)) V, multi-head, from a (B*S, 3H) QKV slab."""
    _, threeH = qkv2d.shape
    H = threeH // 3
    Dh = H // nH
    scale = 1.0 / math.sqrt(Dh)
    tq = _attn_tile(S, tq)
    tk = _attn_tile(S, tk)
    grid = (B, nH, S // tq, S // tk)

    kernel = _make_flash_attn_kernel(scale, MXU_DTYPE)
    scratch = [pltpu.VMEM((tq, 1), jnp.float32),
               pltpu.VMEM((tq, 1), jnp.float32),
               pltpu.VMEM((tq, Dh), jnp.float32)]
    cparams = pltpu.CompilerParams(
        dimension_semantics=("parallel", "parallel", "parallel", "arbitrary"),
        vmem_limit_bytes=_CFG["vmem_limit"])

    if Dh % 128 == 0 and S % 8 == 0:
        # Head slicing folded into BlockSpecs (lane-aligned Dh column blocks);
        # ctx is written straight into a (B, S, H) slab -> no HBM transposes.
        qkv3d = qkv2d.reshape(B, S, 3 * H)
        out = pl.pallas_call(
            kernel,
            out_shape=jax.ShapeDtypeStruct((B, S, H), qkv2d.dtype),
            grid_spec=pltpu.PrefetchScalarGridSpec(
                num_scalar_prefetch=0,
                grid=grid,
                in_specs=[
                    pl.BlockSpec((None, tq, Dh),
                                 lambda b, h, qi, ki: (b, qi, h)),
                    pl.BlockSpec((None, tk, Dh),
                                 lambda b, h, qi, ki: (b, ki, nH + h)),
                    pl.BlockSpec((None, tk, Dh),
                                 lambda b, h, qi, ki: (b, ki, 2 * nH + h)),
                ],
                out_specs=pl.BlockSpec((None, tq, Dh),
                                       lambda b, h, qi, ki: (b, qi, h)),
                scratch_shapes=scratch,
            ),
            compiler_params=cparams,
        )(qkv3d, qkv3d, qkv3d)
        return out.reshape(B * S, H)

    # Fallback for non-lane-aligned Dh: one layout transpose in HBM, same kernel.
    qkv = qkv2d.reshape(B, S, 3, nH, Dh).transpose(2, 0, 3, 1, 4)  # (3,B,nH,S,Dh)
    q, k, v = qkv[0], qkv[1], qkv[2]
    out = pl.pallas_call(
        kernel,
        out_shape=jax.ShapeDtypeStruct((B, nH, S, Dh), qkv2d.dtype),
        grid_spec=pltpu.PrefetchScalarGridSpec(
            num_scalar_prefetch=0,
            grid=grid,
            in_specs=[
                pl.BlockSpec((None, None, tq, Dh),
                             lambda b, h, qi, ki: (b, h, qi, 0)),
                pl.BlockSpec((None, None, tk, Dh),
                             lambda b, h, qi, ki: (b, h, ki, 0)),
                pl.BlockSpec((None, None, tk, Dh),
                             lambda b, h, qi, ki: (b, h, ki, 0)),
            ],
            out_specs=pl.BlockSpec((None, None, tq, Dh),
                                   lambda b, h, qi, ki: (b, h, qi, 0)),
            scratch_shapes=scratch,
        ),
        compiler_params=cparams,
    )(q, k, v)
    return out.transpose(0, 2, 1, 3).reshape(B * S, H)


# ---------------------------------------------------------------------------
# Fused residual-add + LayerNorm (PyTorch-style: biased var, eps inside sqrt).
# ---------------------------------------------------------------------------
def _make_add_layernorm_kernel(eps):
    def kernel(x_ref, r_ref, g_ref, b_ref, o_ref):
        x = x_ref[...].astype(jnp.float32) + r_ref[...].astype(jnp.float32)
        u = jnp.mean(x, axis=-1, keepdims=True)
        xc = x - u
        var = jnp.mean(xc * xc, axis=-1, keepdims=True)
        y = xc * jax.lax.rsqrt(var + eps)
        y = y * g_ref[...].astype(jnp.float32) + b_ref[...].astype(jnp.float32)
        o_ref[...] = y.astype(o_ref.dtype)
    return kernel


def add_layernorm(x2d, res2d, gamma, beta, eps=1e-12, tr=256):
    M, H = x2d.shape
    tr, Mp = _choose_tile(M, tr, 8)
    xp = x2d if Mp == M else jnp.pad(x2d, ((0, Mp - M), (0, 0)))
    rp = res2d if Mp == M else jnp.pad(res2d, ((0, Mp - M), (0, 0)))
    out = pl.pallas_call(
        _make_add_layernorm_kernel(eps),
        out_shape=jax.ShapeDtypeStruct((Mp, H), x2d.dtype),
        grid_spec=pltpu.PrefetchScalarGridSpec(
            num_scalar_prefetch=0,
            grid=(Mp // tr,),
            in_specs=[
                pl.BlockSpec((tr, H), lambda i: (i, 0)),
                pl.BlockSpec((tr, H), lambda i: (i, 0)),
                pl.BlockSpec((1, H), lambda i: (0, 0)),
                pl.BlockSpec((1, H), lambda i: (0, 0)),
            ],
            out_specs=pl.BlockSpec((tr, H), lambda i: (i, 0)),
        ),
        compiler_params=pltpu.CompilerParams(
            dimension_semantics=("parallel",),
            vmem_limit_bytes=_CFG["vmem_limit"]),
    )(xp, rp, gamma.reshape(1, H), beta.reshape(1, H))
    if Mp != M:
        out = out[:M]
    return out


# ---------------------------------------------------------------------------
# Full Transformer block forward.
# ---------------------------------------------------------------------------
def transformer_forward(hidden_states, params):
    B, S, H = hidden_states.shape
    nH = params["num_heads"]
    x2d = hidden_states.reshape(B * S, H)

    # Fused Q/K/V projection: one matmul, x read from HBM once.
    qkv = linear_forward(x2d, params["qkv_w"], params["qkv_b"])        # (B*S, 3H)

    # Flash-style multi-head attention (head split folded into BlockSpecs).
    ctx = attention_from_qkv(qkv, B, S, nH)                            # (B*S, H)

    # SelfOutput: dense + residual + LayerNorm.
    attn_dense = linear_forward(ctx, params["ao_w"], params["ao_b"])
    attn_out = add_layernorm(attn_dense, x2d, params["ln1_w"], params["ln1_b"])

    # Intermediate: dense + exact erf-GELU fused in the matmul epilogue.
    inter = linear_forward(attn_out, params["i_w"], params["i_b"],
                           activation="gelu")

    # Output: dense + residual + LayerNorm.
    out_dense = linear_forward(inter, params["o_w"], params["o_b"])
    out = add_layernorm(out_dense, attn_out, params["ln2_w"], params["ln2_b"])

    return out.reshape(B, S, H)


# ---------------------------------------------------------------------------
# Parameter init (matches the PyTorch module's reset_params / LayerNorm init).
# Weights are stored pre-transposed to (in, out) and in bf16 (HBM traffic /2).
# ---------------------------------------------------------------------------
def _init_linear(key, in_features, out_features):
    bound = math.sqrt(6.0 / (in_features + out_features))
    w = jax.random.uniform(key, (in_features, out_features), dtype=jnp.float32,
                           minval=-bound, maxval=bound).astype(PARAM_DTYPE)
    b = jnp.zeros((out_features,), dtype=jnp.float32)
    return w, b


def _init_layernorm(key, hidden):
    bound = math.sqrt(6.0 / hidden)
    kw, kb = jax.random.split(key)
    g = jax.random.uniform(kw, (hidden,), dtype=jnp.float32, minval=-bound, maxval=bound)
    b = jax.random.uniform(kb, (hidden,), dtype=jnp.float32, minval=-bound, maxval=bound)
    return g, b


def init_transformer_params(key, hidden, intermediate, num_heads):
    keys = jax.random.split(key, 8)
    q_w, q_b = _init_linear(keys[0], hidden, hidden)
    k_w, k_b = _init_linear(keys[1], hidden, hidden)
    v_w, v_b = _init_linear(keys[2], hidden, hidden)
    qkv_w = jnp.concatenate([q_w, k_w, v_w], axis=1)     # (H, 3H)
    qkv_b = jnp.concatenate([q_b, k_b, v_b], axis=0)     # (3H,)
    ao_w, ao_b = _init_linear(keys[3], hidden, hidden)
    i_w, i_b = _init_linear(keys[4], hidden, intermediate)
    o_w, o_b = _init_linear(keys[5], intermediate, hidden)
    ln1_w, ln1_b = _init_layernorm(keys[6], hidden)
    ln2_w, ln2_b = _init_layernorm(keys[7], hidden)
    return dict(num_heads=num_heads, qkv_w=qkv_w, qkv_b=qkv_b,
                ao_w=ao_w, ao_b=ao_b, i_w=i_w, i_b=i_b, o_w=o_w, o_b=o_b,
                ln1_w=ln1_w, ln1_b=ln1_b, ln2_w=ln2_w, ln2_b=ln2_b)


# ---------------------------------------------------------------------------
# Plain-JAX f32 reference (same stored params) for the correctness check.
# ---------------------------------------------------------------------------
def _reference_transformer(hidden_states, p):
    B, S, H = hidden_states.shape
    nH = p["num_heads"]
    Dh = H // nH
    x2d = hidden_states.reshape(B * S, H)

    def lin(x, w, b):
        return x @ w.astype(jnp.float32) + b

    def ln(x, g, b, eps=1e-12):
        u = x.mean(-1, keepdims=True)
        s = ((x - u) ** 2).mean(-1, keepdims=True)
        return g * ((x - u) / jnp.sqrt(s + eps)) + b

    qkv = lin(x2d, p["qkv_w"], p["qkv_b"])
    q, k, v = jnp.split(qkv, 3, axis=-1)

    def heads(t):
        return t.reshape(B, S, nH, Dh).transpose(0, 2, 1, 3)

    q, k, v = heads(q), heads(k), heads(v)
    scores = jnp.einsum("bhqd,bhkd->bhqk", q, k) / math.sqrt(Dh)
    probs = jax.nn.softmax(scores, axis=-1)
    ctx = jnp.einsum("bhqk,bhkd->bhqd", probs, v)
    ctx = ctx.transpose(0, 2, 1, 3).reshape(B * S, H)

    attn_out = ln(lin(ctx, p["ao_w"], p["ao_b"]) + x2d, p["ln1_w"], p["ln1_b"])
    inter = lin(attn_out, p["i_w"], p["i_b"])
    inter = inter * 0.5 * (1.0 + jax.lax.erf(inter / math.sqrt(2.0)))
    out = ln(lin(inter, p["o_w"], p["o_b"]) + attn_out, p["ln2_w"], p["ln2_b"])
    return out.reshape(B, S, H)


if __name__ == "__main__":
    key = jax.random.PRNGKey(0)
    k_x, k_p = jax.random.split(key)

    # Small but lane/MXU-aligned demo shapes (Dh = 128 so the BlockSpec head
    # slicing is lane-dense; all matmul dims are multiples of 128).
    batch, seq, hidden, intermediate, num_heads = 2, 128, 256, 512, 2

    hidden_states = jax.random.normal(k_x, (batch, seq, hidden), dtype=jnp.float32)
    params = init_transformer_params(k_p, hidden, intermediate, num_heads)

    out = jax.block_until_ready(transformer_forward(hidden_states, params))

    ref = _reference_transformer(hidden_states, params)
    assert out.shape == (batch, seq, hidden)
    err = float(jnp.max(jnp.abs(out - ref)))
    # bf16 MXU operands (f32 accumulation) vs. pure-f32 reference.
    assert err < 3e-2, f"max abs err = {err}"

    print("KERNEL_OK")
</pallas_src>

<mosaic_0001>
module attributes {stable_mosaic.version = 11 : i64} {
  func.func @kernel(%arg0: i32, %arg1: i32, %arg2: i32, %arg3: memref<256x256xf32, #tpu.memory_space<vmem>>, %arg4: memref<256x384xbf16, #tpu.memory_space<vmem>>, %arg5: memref<1x384xf32, #tpu.memory_space<vmem>>, %arg6: memref<256x384xf32, #tpu.memory_space<vmem>>) attributes {dimension_semantics = [#tpu.dimension_semantics<parallel>, #tpu.dimension_semantics<parallel>, #tpu.dimension_semantics<arbitrary>], iteration_bounds = array<i64: 1, 2, 1>, scalar_prefetch = 0 : i64, scratch_operands = 0 : i64, tpu.core_type = #tpu.core_type<tc>, window_params = [{transform_indices = @transform_0, window_bounds = array<i64: 256, 256>}, {transform_indices = @transform_1, window_bounds = array<i64: 256, 384>}, {transform_indices = @transform_2, window_bounds = array<i64: 1, 384>}, {transform_indices = @transform_3, window_bounds = array<i64: 256, 384>}]} {
    %c0_i32 = arith.constant 0 : i32
    %0 = arith.cmpi eq, %arg2, %c0_i32 : i32
    %1 = arith.extui %0 : i1 to i32
    %c0_i32_0 = arith.constant 0 : i32
    %2 = arith.cmpi ne, %1, %c0_i32_0 : i32
    scf.if %2 {
      %cst_10 = arith.constant 0.000000e+00 : f32
      %13 = vector.broadcast %cst_10 : f32 to vector<256x384xf32>
      %c0_11 = arith.constant 0 : index
      %c0_12 = arith.constant 0 : index
      %14 = vector.load %arg6[%c0_11, %c0_12] : memref<256x384xf32, #tpu.memory_space<vmem>>, vector<256x384xf32>
      tpu.vector_store %arg6[%c0_11, %c0_12], %13 {strides = array<i32>} : memref<256x384xf32, #tpu.memory_space<vmem>>, vector<256x384xf32>,
    } else {
    }
    %c0 = arith.constant 0 : index
    %c0_1 = arith.constant 0 : index
    %3 = vector.load %arg6[%c0, %c0_1] : memref<256x384xf32, #tpu.memory_space<vmem>>, vector<256x384xf32>
    %c0_2 = arith.constant 0 : index
    %c0_3 = arith.constant 0 : index
    %4 = vector.load %arg3[%c0_2, %c0_3] : memref<256x256xf32, #tpu.memory_space<vmem>>, vector<256x256xf32>
    %5 = arith.truncf %4 : vector<256x256xf32> to vector<256x256xbf16>
    %c0_4 = arith.constant 0 : index
    %c0_5 = arith.constant 0 : index
    %6 = vector.load %arg4[%c0_4, %c0_5] : memref<256x384xbf16, #tpu.memory_space<vmem>>, vector<256x384xbf16>
    %cst = arith.constant dense<0.000000e+00> : vector<256x384xf32>
    %7 = tpu.matmul %5, %6, %cst {dimension_numbers = #tpu.dot_dimension_numbers<[1], [0], [0], [1], [0, 0, 1, 1], [], []>} : vector<256x256xbf16>, vector<256x384xbf16>, vector<256x384xf32> -> vector<256x384xf32>
    %8 = arith.addf %3, %7 : vector<256x384xf32>
    %c0_6 = arith.constant 0 : index
    %c0_7 = arith.constant 0 : index
    %9 = vector.load %arg6[%c0_6, %c0_7] : memref<256x384xf32, #tpu.memory_space<vmem>>, vector<256x384xf32>
    tpu.vector_store %arg6[%c0_6, %c0_7], %8 {strides = array<i32>} : memref<256x384xf32, #tpu.memory_space<vmem>>, vector<256x384xf32>,
    %c0_i32_8 = arith.constant 0 : i32
    %10 = arith.cmpi eq, %arg2, %c0_i32_8 : i32
    %11 = arith.extui %10 : i1 to i32
    %c0_i32_9 = arith.constant 0 : i32
    %12 = arith.cmpi ne, %11, %c0_i32_9 : i32
    scf.if %12 {
      %c0_10 = arith.constant 0 : index
      %c0_11 = arith.constant 0 : index
      %13 = vector.load %arg6[%c0_10, %c0_11] : memref<256x384xf32, #tpu.memory_space<vmem>>, vector<256x384xf32>
      %c0_12 = arith.constant 0 : index
      %c0_13 = arith.constant 0 : index
      %14 = vector.load %arg5[%c0_12, %c0_13] : memref<1x384xf32, #tpu.memory_space<vmem>>, vector<1x384xf32>
      %15 = vector.broadcast %14 : vector<1x384xf32> to vector<256x384xf32>
      %16 = arith.addf %13, %15 : vector<256x384xf32>
      %c0_14 = arith.constant 0 : index
      %c0_15 = arith.constant 0 : index
      %17 = vector.load %arg6[%c0_14, %c0_15] : memref<256x384xf32, #tpu.memory_space<vmem>>, vector<256x384xf32>
      tpu.vector_store %arg6[%c0_14, %c0_15], %16 {strides = array<i32>} : memref<256x384xf32, #tpu.memory_space<vmem>>, vector<256x384xf32>,
    } else {
    }
    return
  }
  func.func @transform_0(%arg0: i32, %arg1: i32, %arg2: i32) -> (i32, i32) {
    %c0_i32 = arith.constant 0 : i32
    return %arg0, %arg2 : i32, i32
  }
  func.func @transform_1(%arg0: i32, %arg1: i32, %arg2: i32) -> (i32, i32) {
    %c0_i32 = arith.constant 0 : i32
    return %arg2, %arg1 : i32, i32
  }
  func.func @transform_2(%arg0: i32, %arg1: i32, %arg2: i32) -> (i32, i32) {
    %c0_i32 = arith.constant 0 : i32
    %c0_i32_0 = arith.constant 0 : i32
    return %c0_i32, %arg1 : i32, i32
  }
  func.func @transform_3(%arg0: i32, %arg1: i32, %arg2: i32) -> (i32, i32) {
    %c0_i32 = arith.constant 0 : i32
    return %arg0, %arg1 : i32, i32
  }
}

</mosaic_0001>

<bundles_post_ra>
// kernel: tpu_custom_call.1
= control target key start
LH: loop header
LB: loop body
LE: loop exit
PB: predicated region body
PF: predicated region fallthrough
CT: control target
= control target key end

     0   :  { %8 = vsyncpa [#allocation3], 0  ;;  %s2851_s0 = inlined_call_operand.hbm [shape: f32[256,256], index: 0, kind: input, shape index: {}]   ;;  %s2852_s1 = inlined_call_operand.hbm [shape: bf16[256,768], index: 1, kind: input, shape index: {}]   ;;  %s2853_s2 = inlined_call_operand.vmem [shape: f32[1,768], index: 2, kind: input, shape index: {}]   ;;  %s2854_s3 = inlined_call_operand.hbm [shape: f32[256,768], index: 3, kind: output, shape index: {}]  }
   0x1   :  { %9 = vsyncpa [#allocation6], 0 }
   0x2   :  { %11 = vsyncpa [#allocation6 + $0x1], 0 }
   0x3   :  { %12 = vsyncpa [#allocation4], 0 }
   0x4   :  { %14 = vsyncpa [#allocation4 + $0x1], 0  ;;  %s2367_s12 = smov 0   ;;  %s2369_s13 = smov 0  }
   0x5   :  { %s2371_s14 = smov 0   ;;  %s2373_s15 = smov 0  }
   0x6   :  { %s2375_s16 = smov 0   ;;  %s2377_s17 = smov 0  }
   0x7 LB: > { %s1868_s18 = sadd.s32 4294967295, %s2334_s17   ;;  %s1869_s19 = sadd.s32 4294967294, %s2334_s17   ;;  %s2334_s17 = sphi %s2377_s17, %s20_s17   ;;  %s2330_s16 = sphi %s2375_s16, %s2883_s16   ;;  %s2326_s15 = sphi %s2373_s15, %s2882_s15   ;;  %s2322_s14 = sphi %s2371_s14, %s2881_s14   ;;  %s2318_s13 = sphi %s2369_s13, %s2880_s13   ;;  %s2314_s12 = sphi %s2367_s12, %s2879_s12  }
   0x8   : > { %p83_p0 = scmp.ne.s32.totalorder %s2322_s14, %s2318_s13  ;;  %p84_p1 = scmp.eq.s32.totalorder %s2334_s17, 0 }
   0x9   : > { %p89_p2 = scmp.ne.s32.totalorder %s2318_s13, %s2314_s12  ;;  %p2405_p3 = scmp.eq.s32.totalorder %s1868_s18, 0 }
   0xa   : > { %p141_p4 = scmp.eq.s32.totalorder %s1868_s18, 1  ;;  %p2409_p5 = por %p84_p1, %p83_p0 }
   0xb   : > { %s2861_s21 = scalar_select %p2405_p3, 1, 0 }
   0xc   : > { %p147_p6 = scmp.eq.s32.totalorder %s1869_s19, 1  ;;  %p2415_p7 = por %p2405_p3, %p89_p2 }
   0xd   : > { %p2419_p8 = por %p141_p4, %p83_p0  ;;  %p1870_p10 = scmp.ge.s32.totalorder %s2334_s17, 1 }
   0xe   : > { %s2863_s23 = scalar_select %p2415_p7, 1, 0 }
   0xf   : > { %s2864_s24 = scalar_select %p2419_p8, 1, 0 }
  0x10   : > { %p2423_p9 = por %p147_p6, %p89_p2  ;;  %p154_p11 = scmp.lt.s32.totalorder %s2334_s17, 3 }
  0x11   : > { %s2336_s27 = smov [#allocation2]   ;;  %p2065_p1 = scmp.lt.s32.totalorder %s2334_s17, 2 }
  0x12   : > { %s2865_s25 = scalar_select %p2423_p9, 1, 0 }
  0x13   : > { %p2429_p12 = pnand %p1870_p10, %p154_p11  ;;  %s172_s28 = sshll.u32 %s2336_s27, 4  ;;  %s2433_s28 = int_to_ptr.vmem [resolvable:$true] %s172_s28 }
  0x14   : > { %p2447_p4 = pnand %p2065_p1, %p2409_p5  ;;  %s35_s4 = sadd.s32 1, %s2330_s16 }
  0x15   : > { %s2866_s26 = scalar_select %p2429_p12, 1, 0 }
  0x16   : > { %p2052_p13 = pneg %p2429_p12  ;;  %p2452_p6 = scmp.ge.s32.totalorder %s35_s4, 2 }
  0x17   : > { %s2868_s30 = scalar_select %p2447_p4, 1, 0 }
  0x18   : > { %p2441_p2 = pnand %p2052_p13, %p2405_p3  ;;  %s2190_s8 = scalar_lea.hbm %s2851_s0, 8192 }
  0x19   : > { %s2869_s5 = scalar_select %p2452_p6, 1, 0 }
  0x1a   : > { %p2191_p10 = scmp.ne.s32.totalorder %s2851_s0, %s2190_s8  ;;  %p2192_p11 = pneg %p2441_p2 }
  0x1b   : > { %p2197_p1 = scmp.lt.u32.totalorder %s2190_s8, %s2851_s0 }
  0x1c   : > { %p2193_p13 = pnand %p2192_p11, %p2191_p10 }
  0x1e   : > { %p2194_p5 = pneg %p2193_p13 }
  0x20   : > { %p2199_p0 = pnand %p2197_p1, %p2194_p5 }
  0x22   : > { %2202 = shalt.err (!%p2199_p0)
}
  0x23   : > { %s2203_s19 = scalar_lea.vmem %s2433_s28, 8192  ;;  %p2211_p3 = scmp.lt.s32.totalorder %s2433_s28, %s2433_s28 }
  0x24   : > { %p2204_p9 = scmp.ne.s32.totalorder %s2433_s28, %s2203_s19  ;;  %p2212_p12 = scmp.lt.s32.totalorder %s2203_s19, %s2203_s19 }
  0x26   : > { %p2206_p8 = pnand %p2204_p9, %p2192_p11  ;;  %p2213_p4 = por %p2212_p12, %p2211_p3 }
  0x28   : > { %p2207_p7 = pneg %p2206_p8 }
  0x2a   : > { %p2214_p6 = pnand %p2213_p4, %p2207_p7 }
  0x2c   : > { %2217 = shalt.err (!%p2214_p6)
}
  0x2d   : > { %s2337_s22 = smov 256   ;;  %s2338_s27 = smov 16  }
  0x2e   : > { %2055 = dma.hbm_to_vmem [thread:$0]  (!%p2441_p2), %s2851_s0, 8192, %s2433_s28, [#allocation3], %s2337_s22, %s2337_s22, %s2338_s27  }
  0x2f   : > { %s186_s8 = sand.u32 1, %s2322_s14   ;;  %p2870_p3 = scmp.ne.s32.totalorder %s2869_s5, 0 }
  0x30   : > { %s2041_s9 = smul.u32 384, %s186_s8  ;;  %s2871_s22 = sadd.s32 1, %s2322_s14 }
  0x31   : > { %s2885_s4 = smov (%p2870_p3, %s35_s4), 0  ;;  %s1927_s11 = smul.u32 192, %s2330_s16 }
  0x32   : > { %s72_s10 = ssub.s32 %s2330_s16, %s2885_s4  ;;  %s190_s28 = scalar_lea.vmem [#allocation5], %s2041_s9 }
  0x33   : > { %p74_p7 = scmp.eq.s32.totalorder %s72_s10, 0  ;;  %s2488_s20 = scalar_lea.hbm %s2852_s1, %s1927_s11 }
  0x34   : > { %s200_s29 = sshll.u32 %s190_s28, 4  ;;  %s2497_s27 = scalar_lea.sflag [#allocation6], %s186_s8  ;;  %s2495_s29 = int_to_ptr.vmem [resolvable:$true] %s200_s29 }
  0x35   : > { %s2493_s5 = scalar_select %p74_p7, %s2322_s14, %s2871_s22  }
  0x36   : > { %s2218_s6 = scalar_lea.hbm %s2488_s20, 6144  ;;  %p2872_p9 = scmp.ne.s32.totalorder %s2868_s30, 0 }
  0x37   : > { %p2219_p8 = scmp.ne.s32.totalorder %s2488_s20, %s2218_s6  ;;  %s2223_s9 = scalar_lea.hbm %s2852_s1, 12288 }
  0x38   : > { %p2220_p12 = pneg %p2872_p9  ;;  %p2224_p4 = scmp.lt.u32.totalorder %s2488_s20, %s2852_s1 }
  0x39   : > { %p2225_p6 = scmp.lt.u32.totalorder %s2223_s9, %s2218_s6  ;;  %p2227_p11 = scmp.lt.u32.totalorder %s2218_s6, %s2488_s20 }
  0x3a   : > { %p2221_p0 = pnand %p2220_p12, %p2219_p8 }
  0x3b   : > { %p2226_p10 = por %p2225_p6, %p2224_p4 }
  0x3c   : > { %p2222_p2 = pneg %p2221_p0 }
  0x3d   : > { %p2228_p13 = por %p2227_p11, %p2226_p10 }
  0x3f   : > { %p2229_p5 = pnand %p2228_p13, %p2222_p2 }
  0x41   : > { %2232 = shalt.err (!%p2229_p5)
}
  0x42   : > { %s2233_s8 = scalar_lea.vmem %s2495_s29, 6144  ;;  %s2339_s19 = smov [#allocation5]  }
  0x43   : > { %p2234_p1 = scmp.ne.s32.totalorder %s2495_s29, %s2233_s8  ;;  %s2238_s28 = sshll.u32 %s2339_s19, 4  ;;  %s2239_s28 = int_to_ptr.vmem [resolvable:$false] %s2238_s28 }
  0x44   : > { %s2240_s22 = scalar_lea.vmem %s2239_s28, 12288  ;;  %p2241_p8 = scmp.lt.s32.totalorder %s2495_s29, %s2239_s28 }
  0x45   : > { %p2236_p3 = pnand %p2234_p1, %p2220_p12  ;;  %p2242_p0 = scmp.lt.s32.totalorder %s2240_s22, %s2233_s8 }
  0x47   : > { %p2237_p7 = pneg %p2236_p3  ;;  %p2243_p4 = por %p2242_p0, %p2241_p8 }
  0x49   : > { %p2244_p6 = pnand %p2243_p4, %p2237_p7 }
  0x4b   : > { %2247 = shalt.err (!%p2244_p6)
}
  0x4c   : > { %s2340_s6 = smov 384   ;;  %s2341_s7 = smov 192  }
  0x4d   : > { %s2342_s10 = smov 12   ;;  %p2873_p12 = scmp.ne.s32.totalorder %s2866_s26, 0 }
  0x4e   : > { %2059 = dma.hbm_to_vmem [thread:$0]  (!%p2872_p9), %s2488_s20, 6144, %s2495_s29, %s2497_s27, %s2340_s6, %s2341_s7, %s2342_s10  }
  0x4f   : > { %220 = sbr.rel (%p2873_p12) target bundleno = 510 (0x1fe), region = 32  ;;  %p2874_p2 = scmp.ne.s32.totalorder (!%p2873_p12), %s2861_s21, 0 }
  0x56   : > { %2301 = dma.done.wait (%p2874_p2), [#allocation3], 8192  }
  0x57   : > { %2303 = vsyncadd (%p2874_p2), [#allocation3], 4294959104  ;;  %s2532_s9 = sand.u32 1, %s2318_s13   ;;  %p2875_p9 = scmp.ne.s32.totalorder %s2863_s23, 0 }
  0x58   : > { %s2042_s11 = smul.u32 384, %s2532_s9  ;;  %s227_s18 = scalar_lea.sflag [#allocation6], %s2532_s9 }
  0x5a   : > { %s2536_s8 = scalar_lea.vmem [#allocation5], %s2042_s11 }
  0x5b   : > { %2305 = dma.done.wait (%p2875_p9), %s227_s18, 6144  }
  0x5c   : > { %2307 = vsyncadd (%p2875_p9), %s227_s18, 4294961152  ;;  %v2126_v0 = vld [vmem:[%s2536_s8 + $0x4] ss:$12 sps:$4 sm:$0xff]   ;;  %v2128_v1 = vld [vmem:[%s2536_s8] ss:$12 sps:$4 sm:$0xff]   ;;  %s261_s20 = smul.u32 3, %s2326_s15 }
  0x5d   : > { %881 = vmatprep.subr.bf16.mxu0 %v2126_v0  ;;  %v2129_v2 = vld [vmem:[%s2536_s8 + $0x1c] ss:$12 sps:$4 sm:$0xff]   ;;  %v2131_v3 = vld [vmem:[%s2536_s8 + $0x18] ss:$12 sps:$4 sm:$0xff]   ;;  %v2132_v4 = vld [vmem:[%s2536_s8 + $0x34] ss:$12 sps:$4 sm:$0xff]  }
  0x5e   : > { %882 = vmatpush1.bf16.msra.mxu0 %v2128_v1  ;;  %v2134_v5 = vld [vmem:[%s2536_s8 + $0x30] ss:$12 sps:$4 sm:$0xff]   ;;  %v2135_v6 = vld [vmem:[%s2536_s8 + $0x4c] ss:$12 sps:$4 sm:$0xff]   ;;  %v2147_v7 = vld [vmem:[%s2536_s8 + $0xc8] ss:$12 sps:$4 sm:$0xff]  }
  0x5f   : > { %883 = vmatprep.subr.bf16.mxu0 %v2129_v2  ;;  %v2137_v8 = vld [vmem:[%s2536_s8 + $0x48] ss:$12 sps:$4 sm:$0xff]   ;;  %v2138_v9 = vld [vmem:[%s2536_s8 + $0x64] ss:$12 sps:$4 sm:$0xff]   ;;  %1929 = vmatprep.subr.bf16.mxu1 %v2147_v7  ;;  %v2152_v11 = vld [vmem:[%s2536_s8 + $0xe0] ss:$12 sps:$4 sm:$0xff]  }
  0x60   : > { %v2150_v10 = vld [vmem:[%s2536_s8 + $0x8] ss:$12 sps:$4 sm:$0xff]   ;;  %v2140_v12 = vld [vmem:[%s2536_s8 + $0x60] ss:$12 sps:$4 sm:$0xff]   ;;  %v2157_v15 = vld [vmem:[%s2536_s8 + $0xf8] ss:$12 sps:$4 sm:$0xff]  }
  0x61   : > { %1930 = vmatpush3.bf16.msra.mxu1 %v2150_v10  ;;  %v2141_v13 = vld [vmem:[%s2536_s8 + $0x7c] ss:$12 sps:$4 sm:$0xff]   ;;  %v2155_v14 = vld [vmem:[%s2536_s8 + $0x20] ss:$12 sps:$4 sm:$0xff]   ;;  %v2143_v16 = vld [vmem:[%s2536_s8 + $0x78] ss:$12 sps:$4 sm:$0xff]  }
  0x62   : > { %884 = vmatpush1.bf16.msra.mxu0 %v2131_v3  ;;  %1931 = vmatprep.subr.bf16.mxu1 %v2152_v11  ;;  %v2160_v17 = vld [vmem:[%s2536_s8 + $0x38] ss:$12 sps:$4 sm:$0xff]   ;;  %v2144_v18 = vld [vmem:[%s2536_s8 + $0x94] ss:$12 sps:$4 sm:$0xff]   ;;  %v2162_v19 = vld [vmem:[%s2536_s8 + $0x110] ss:$12 sps:$4 sm:$0xff]  }
  0x63   : > { %885 = vmatprep.subr.bf16.mxu0 %v2132_v4  ;;  %v2146_v20 = vld [vmem:[%s2536_s8 + $0x90] ss:$12 sps:$4 sm:$0xff]   ;;  %v2167_v22 = vld [vmem:[%s2536_s8 + $0x128] ss:$12 sps:$4 sm:$0xff]   ;;  %v2148_v23 = vld [vmem:[%s2536_s8 + $0xac] ss:$12 sps:$4 sm:$0xff]  }
  0x64   : > { %v2165_v21 = vld [vmem:[%s2536_s8 + $0x50] ss:$12 sps:$4 sm:$0xff]   ;;  %v2151_v24 = vld [vmem:[%s2536_s8 + $0xa8] ss:$12 sps:$4 sm:$0xff]   ;;  %v2172_v26 = vld [vmem:[%s2536_s8 + $0x140] ss:$12 sps:$4 sm:$0xff]  }
  0x65   : > { %1932 = vmatpush3.bf16.msra.mxu1 %v2155_v14  ;;  %v2170_v25 = vld [vmem:[%s2536_s8 + $0x68] ss:$12 sps:$4 sm:$0xff]   ;;  %v2153_v27 = vld [vmem:[%s2536_s8 + $0xc4] ss:$12 sps:$4 sm:$0xff]   ;;  %v2156_v28 = vld [vmem:[%s2536_s8 + $0xc0] ss:$12 sps:$4 sm:$0xff]  }
  0x66   : > { %886 = vmatpush1.bf16.msra.mxu0 %v2134_v5  ;;  %1933 = vmatprep.subr.bf16.mxu1 %v2157_v15  ;;  %v2175_v29 = vld [vmem:[%s2536_s8 + $0x80] ss:$12 sps:$4 sm:$0xff]   ;;  %v2177_v30 = vld [vmem:[%s2536_s8 + $0x158] ss:$12 sps:$4 sm:$0xff]   ;;  %v2158_v31 = vld [vmem:[%s2536_s8 + $0xdc] ss:$12 sps:$4 sm:$0xff]  }
  0x67   : > { %887 = vmatprep.subr.bf16.mxu0 %v2135_v6  ;;  %v2180_v32 = vld [vmem:[%s2536_s8 + $0x98] ss:$12 sps:$4 sm:$0xff]   ;;  %v2182_v34 = vld [vmem:[%s2536_s8 + $0x170] ss:$12 sps:$4 sm:$0xff]   ;;  %v2163_v35 = vld [vmem:[%s2536_s8 + $0xf4] ss:$12 sps:$4 sm:$0xff]  }
  0x68   : > { %v2161_v33 = vld [vmem:[%s2536_s8 + $0xd8] ss:$12 sps:$4 sm:$0xff]   ;;  %v466_v36 = vld [vmem:[#allocation2 + $0x8] sm:$0xff]  ;;  %v2185_v39 = vld [vmem:[%s2536_s8 + $0xb0] ss:$12 sps:$4 sm:$0xff]   ;;  %p262_p10 = scmp.lt.s32.totalorder %s261_s20, 5 }
  0x69   : > { %1934 = vmatpush3.bf16.msra.mxu1 %v2160_v17  ;;  %v468_v37 = vld [vmem:[#allocation2 + $0x18] sm:$0xff]  ;;  %v465_v40 = vld [vmem:[#allocation2] sm:$0xff]  ;;  %v467_v41 = vld [vmem:[#allocation2 + $0x10] sm:$0xff]  ;;  %s2043_s30 = smul.u32 768, %s2532_s9  ;;  %p2876_p13 = scmp.ne.s32.totalorder %s2864_s24, 0 }
  0x6a   : > { %888 = vmatpush1.bf16.msra.mxu0 %v2137_v8  ;;  %1935 = vmatprep.subr.bf16.mxu1 %v2162_v19  ;;  %v530_v38 = vpack.c.bf16 %v468_v37, %v466_v36  ;;  %v2166_v42 = vld [vmem:[%s2536_s8 + $0xf0] ss:$12 sps:$4 sm:$0xff]   ;;  %v470_v43 = vld [vmem:[#allocation2 + $0x28] sm:$0xff]  ;;  %v529_v46 = vpack.c.bf16 %v467_v41, %v465_v40  ;;  %v469_v50 = vld [vmem:[#allocation2 + $0x20] sm:$0xff]  ;;  %s2887_s20 = smov (!%p262_p10, %s261_s20), 5  ;;  %s1928_s27 = smul.u32 384, %s2326_s15 }
  0x6b   : > { %889 = vmatprep.subr.bf16.mxu0 %v2138_v9  ;;  %v472_v44 = vld [vmem:[#allocation2 + $0x38] sm:$0xff]  ;;  %v2171_v48 = vld [vmem:[%s2536_s8 + $0x108] ss:$12 sps:$4 sm:$0xff]   ;;  %v2173_v49 = vld [vmem:[%s2536_s8 + $0x124] ss:$12 sps:$4 sm:$0xff]   ;;  %s264_s26 = scalar_lea.vmem %s2853_s2, %s2887_s20  ;;  %s2598_s29 = scalar_lea.vmem [#allocation7], %s2043_s30 }
  0x6c   : > { %v2168_v45 = vld [vmem:[%s2536_s8 + $0x10c] ss:$12 sps:$4 sm:$0xff]   ;;  %1106 = vmatprep.mubr.bf16.mxu1 %v530_v38  ;;  %913 = vmatprep.mubr.bf16.mxu0 %v530_v38  ;;  %v532_v47 = vpack.c.bf16 %v472_v44, %v470_v43  ;;  %v471_v51 = vld [vmem:[#allocation2 + $0x30] sm:$0xff]  ;;  %v2178_v55 = vld [vmem:[%s2536_s8 + $0x13c] ss:$12 sps:$4 sm:$0xff]   ;;  %s1752_s19 = sshll.u32 %s2598_s29, 4  ;;  %s2794_s6 = scalar_lea.hbm %s2854_s3, %s1928_s27  ;;  %s2798_s19 = int_to_ptr.vmem [resolvable:$true] %s1752_s19 }
  0x6d   : > { %1936 = vmatpush3.bf16.msra.mxu1 %v2165_v21  ;;  %v2176_v52 = vld [vmem:[%s2536_s8 + $0x120] ss:$12 sps:$4 sm:$0xff]   ;;  %v476_v54 = vld [vmem:[#allocation2 + $0x58] sm:$0xff]  ;;  %v531_v56 = vpack.c.bf16 %v471_v51, %v469_v50  ;;  %v475_v61 = vld [vmem:[#allocation2 + $0x50] sm:$0xff]  ;;  %s1736_s15 = scalar_lea.sflag [#allocation4], %s2532_s9  ;;  %s2248_s7 = scalar_lea.vmem %s2798_s19, 12288 }
  0x6e   : > { %890 = vmatpush1.bf16.msra.mxu0 %v2140_v12  ;;  %1937 = vmatprep.subr.bf16.mxu1 %v2167_v22  ;;  %v474_v53 = vld [vmem:[#allocation2 + $0x48] sm:$0xff]  ;;  %v2181_v58 = vld [vmem:[%s2536_s8 + $0x138] ss:$12 sps:$4 sm:$0xff]   ;;  %v2183_v59 = vld [vmem:[%s2536_s8 + $0x154] ss:$12 sps:$4 sm:$0xff]   ;;  %p2249_p11 = scmp.ne.s32.totalorder %s2798_s19, %s2248_s7  ;;  %s2343_s10 = smov [#allocation7]  }
  0x6f   : > { %891 = vmatprep.subr.bf16.mxu0 %v2141_v13  ;;  %v534_v57 = vpack.c.bf16 %v476_v54, %v474_v53  ;;  %v473_v60 = vld [vmem:[#allocation2 + $0x40] sm:$0xff]  ;;  %v2186_v62 = vld [vmem:[%s2536_s8 + $0x150] ss:$12 sps:$4 sm:$0xff]   ;;  %v478_v63 = vld [vmem:[#allocation2 + $0x68] sm:$0xff]  ;;  %s2252_s11 = sshll.u32 %s2343_s10, 4  ;;  %s2253_s11 = int_to_ptr.vmem [resolvable:$false] %s2252_s11 }
  0x70   : > { %v480_v0 = vld [vmem:[#allocation2 + $0x78] sm:$0xff]  ;;  %v533_v2 = vpack.c.bf16 %v475_v61, %v473_v60  ;;  %v2189_v4 = vld [vmem:[%s2536_s8 + $0x168] ss:$12 sps:$4 sm:$0xff]   ;;  %v477_v5 = vld [vmem:[#allocation2 + $0x60] sm:$0xff]  ;;  %p2250_p5 = pnand %p2249_p11, %p2876_p13  ;;  %s2254_s18 = scalar_lea.vmem %s2253_s11, 24576 }
  0x71   : > { %1938 = vmatpush3.bf16.msra.mxu1 %v2170_v25  ;;  %v2187_v1 = vld [vmem:[%s2536_s8 + $0x16c] ss:$12 sps:$4 sm:$0xff]   ;;  %v536_v3 = vpack.c.bf16 %v480_v0, %v478_v63  ;;  %v479_v6 = vld [vmem:[#allocation2 + $0x70] sm:$0xff]  ;;  %v481_v11 = vld [vmem:[#allocation2 + $0x80] sm:$0xff]  ;;  %p2255_p3 = scmp.lt.s32.totalorder %s2798_s19, %s2253_s11  ;;  %p2256_p7 = scmp.lt.s32.totalorder %s2254_s18, %s2248_s7 }
  0x72   : > { %892 = vmatpush1.bf16.msra.mxu0 %v2143_v16  ;;  %1939 = vmatprep.subr.bf16.mxu1 %v2172_v26  ;;  %v482_v7 = vld [vmem:[#allocation2 + $0x88] sm:$0xff]  ;;  %v484_v8 = vld [vmem:[#allocation2 + $0x98] sm:$0xff]  ;;  %v535_v9 = vpack.c.bf16 %v479_v6, %v477_v5  ;;  %v483_v12 = vld [vmem:[#allocation2 + $0x90] sm:$0xff]  ;;  %p2251_p1 = pneg %p2250_p5 }
  0x73   : > { %893 = vmatprep.subr.bf16.mxu0 %v2144_v18  ;;  %v538_v10 = vpack.c.bf16 %v484_v8, %v482_v7  ;;  %v486_v13 = vld [vmem:[#allocation2 + $0xa8] sm:$0xff]  ;;  %v488_v14 = vld [vmem:[#allocation2 + $0xb8] sm:$0xff]  ;;  %v537_v15 = vpack.c.bf16 %v483_v12, %v481_v11  ;;  %v485_v17 = vld [vmem:[#allocation2 + $0xa0] sm:$0xff]  ;;  %p2257_p8 = por %p2256_p7, %p2255_p3 }
  0x74   : > { %v540_v16 = vpack.c.bf16 %v488_v14, %v486_v13  ;;  %v487_v18 = vld [vmem:[#allocation2 + $0xb0] sm:$0xff]  ;;  %v490_v19 = vld [vmem:[#allocation2 + $0xc8] sm:$0xff]  ;;  %v496_v26 = vld [vmem:[#allocation2 + $0xf8] sm:$0xff] }
  0x75   : > { %1940 = vmatpush3.bf16.msra.mxu1 %v2175_v29  ;;  %v539_v21 = vpack.c.bf16 %v487_v18, %v485_v17  ;;  %v494_v25 = vld [vmem:[#allocation2 + $0xe8] sm:$0xff]  ;;  %v493_v29 = vld [vmem:[#allocation2 + $0xe0] sm:$0xff]  ;;  %v499_v36 = vld [vmem:[#allocation2 + $0x110] sm:$0xff]  ;;  %p2258_p0 = pnand %p2257_p8, %p2251_p1 }
  0x76   : > { %894 = vmatpush1.bf16.msra.mxu0 %v2146_v20  ;;  %1941 = vmatprep.subr.bf16.mxu1 %v2177_v30  ;;  %v492_v20 = vld [vmem:[#allocation2 + $0xd8] sm:$0xff]  ;;  %v495_v30 = vld [vmem:[#allocation2 + $0xf0] sm:$0xff]  ;;  %v502_v37 = vld [vmem:[#allocation2 + $0x128] sm:$0xff] }
  0x77   : > { %895 = vmatprep.subr.bf16.mxu0 %v2148_v23  ;;  %v542_v22 = vpack.c.bf16 %v492_v20, %v490_v19  ;;  %v489_v23 = vld [vmem:[#allocation2 + $0xc0] sm:$0xff]  ;;  %v504_v38 = vld [vmem:[#allocation2 + $0x138] sm:$0xff]  ;;  %v506_v43 = vld [vmem:[#allocation2 + $0x148] sm:$0xff] }
  0x78   : > { %v548_v40 = vpack.c.bf16 %v504_v38, %v502_v37  ;;  %v501_v41 = vld [vmem:[#allocation2 + $0x120] sm:$0xff]  ;;  %v508_v44 = vld [vmem:[#allocation2 + $0x158] sm:$0xff]  ;;  %v511_v54 = vld [vmem:[#allocation2 + $0x170] sm:$0xff] }
  0x79   : > { %1942 = vmatpush3.bf16.msra.mxu1 %v2180_v32  ;;  %v500_v32 = vld [vmem:[#allocation2 + $0x118] sm:$0xff]  ;;  %v509_v53 = vld [vmem:[#allocation2 + $0x160] sm:$0xff]  ;;  %v515_v60 = vld [vmem:[#allocation2 + $0x190] sm:$0xff] }
  0x7a   : > { %896 = vmatpush1.bf16.msra.mxu0 %v2151_v24  ;;  %1943 = vmatprep.subr.bf16.mxu1 %v2182_v34  ;;  %v491_v24 = vld [vmem:[#allocation2 + $0xd0] sm:$0xff]  ;;  %v512_v50 = vld [vmem:[#allocation2 + $0x178] sm:$0xff]  ;;  %v518_v61 = vld [vmem:[#allocation2 + $0x1a8] sm:$0xff] }
  0x7b   : > { %897 = vmatprep.subr.bf16.mxu0 %v2153_v27  ;;  %v541_v27 = vpack.c.bf16 %v491_v24, %v489_v23  ;;  %v521_v7 = vld [vmem:[#allocation2 + $0x1c0] sm:$0xff]  ;;  %v523_v8 = vld [vmem:[#allocation2 + $0x1d0] sm:$0xff] }
  0x7c   : > { %v557_v11 = vpack.c.bf16 %v523_v8, %v521_v7  ;;  %v525_v13 = vld [vmem:[#allocation2 + $0x1e0] sm:$0xff]  ;;  %v527_v14 = vld [vmem:[#allocation2 + $0x1f0] sm:$0xff] }
  0x7d   : > { %1944 = vmatpush3.bf16.msra.mxu1 %v2185_v39  ;;  %v1526_v19 = vld [vmem:[%s264_s26] sm:$0x7] }
  0x7e   : > { %898 = vmatpush1.bf16.msra.mxu0 %v2156_v28  ;;  %v544_v28 = vpack.c.bf16 %v496_v26, %v494_v25 }
  0x7f   : > { %899 = vmatprep.subr.bf16.mxu0 %v2158_v31  ;;  %v498_v31 = vld [vmem:[#allocation2 + $0x108] sm:$0xff] }
  0x80   : > { %1107 = vmatmul.mubr.bf16.vlgmr.msra.gmra.mrb[0].mxu1 %v529_v46  ;;  %v546_v34 = vpack.c.bf16 %v500_v32, %v498_v31 }
  0x81   : > { %1114 = vmatprep.mubr.bf16.mxu1 %v532_v47 }
  0x82   : > { %900 = vmatpush1.bf16.msra.mxu0 %v2161_v33  ;;  %v543_v33 = vpack.c.bf16 %v495_v30, %v493_v29 }
  0x83   : > { %901 = vmatprep.subr.bf16.mxu0 %v2163_v35  ;;  %v497_v35 = vld [vmem:[#allocation2 + $0x100] sm:$0xff] }
  0x84   : > { %v545_v39 = vpack.c.bf16 %v499_v36, %v497_v35 }
  0x86   : > { %902 = vmatpush1.bf16.msra.mxu0 %v2166_v42  ;;  %v503_v42 = vld [vmem:[#allocation2 + $0x130] sm:$0xff] }
  0x87   : > { %903 = vmatprep.subr.bf16.mxu0 %v2168_v45  ;;  %v547_v45 = vpack.c.bf16 %v503_v42, %v501_v41 }
  0x88   : > { %1115 = vmatmul.mubr.bf16.gmra.mrb[4].mxu1 %v531_v56 }
  0x89   : > { %1122 = vmatprep.mubr.bf16.mxu1 %v534_v57 }
  0x8a   : > { %904 = vmatpush1.bf16.msra.mxu0 %v2171_v48  ;;  %v507_v48 = vld [vmem:[#allocation2 + $0x150] sm:$0xff] }
  0x8b   : > { %905 = vmatprep.subr.bf16.mxu0 %v2173_v49  ;;  %v510_v49 = vld [vmem:[#allocation2 + $0x168] sm:$0xff] }
  0x8e   : > { %906 = vmatpush1.bf16.msra.mxu0 %v2176_v52  ;;  %v552_v52 = vpack.c.bf16 %v512_v50, %v510_v49 }
  0x8f   : > { %907 = vmatprep.subr.bf16.mxu0 %v2178_v55  ;;  %v514_v55 = vld [vmem:[#allocation2 + $0x188] sm:$0xff] }
  0x90   : > { %1123 = vmatmul.mubr.bf16.gmra.mrb[8].mxu1 %v533_v2 }
  0x91   : > { %1130 = vmatprep.mubr.bf16.mxu1 %v536_v3 }
  0x92   : > { %908 = vmatpush1.bf16.msra.mxu0 %v2181_v58 }
  0x93   : > { %909 = vmatprep.subr.bf16.mxu0 %v2183_v59  ;;  %v513_v59 = vld [vmem:[#allocation2 + $0x180] sm:$0xff] }
  0x94   : > { %v553_v63 = vpack.c.bf16 %v515_v60, %v513_v59 }
  0x96   : > { %910 = vmatpush1.bf16.msra.mxu0 %v2186_v62  ;;  %v520_v62 = vld [vmem:[#allocation2 + $0x1b8] sm:$0xff] }
  0x97   : > { %911 = vmatprep.subr.bf16.mxu0 %v2187_v1  ;;  %v556_v0 = vpack.c.bf16 %v520_v62, %v518_v61  ;;  %v517_v1 = vld [vmem:[#allocation2 + $0x1a0] sm:$0xff] }
  0x98   : > { %1131 = vmatmul.mubr.bf16.gmra.mrb[12].mxu1 %v535_v9 }
  0x99   : > { %1138 = vmatprep.mubr.bf16.mxu1 %v538_v10 }
  0x9a   : > { %912 = vmatpush1.bf16.msra.mxu0 %v2189_v4  ;;  %v524_v4 = vld [vmem:[#allocation2 + $0x1d8] sm:$0xff] }
  0x9d   : > { %914 = vmatmul.mubr.bf16.vlgmr.msra.gmra.mrb[0].mxu0 %v529_v46  ;;  %v550_v46 = vpack.c.bf16 %v508_v44, %v506_v43 }
  0x9e   : > { %923 = vmatprep.mubr.bf16.mxu0 %v532_v47  ;;  %v505_v47 = vld [vmem:[#allocation2 + $0x140] sm:$0xff] }
  0x9f   : > { %v549_v51 = vpack.c.bf16 %v507_v48, %v505_v47 }
  0xa0   : > { %1139 = vmatmul.mubr.bf16.gmra.mrb[16].mxu1 %v537_v15 }
  0xa1   : > { %1146 = vmatprep.mubr.bf16.mxu1 %v540_v16 }
  0xa5   : > { %924 = vmatmul.mubr.bf16.gmra.mrb[4].mxu0 %v531_v56  ;;  %v516_v56 = vld [vmem:[#allocation2 + $0x198] sm:$0xff] }
  0xa6   : > { %933 = vmatprep.mubr.bf16.mxu0 %v534_v57  ;;  %v551_v57 = vpack.c.bf16 %v511_v54, %v509_v53  ;;  %v554_v58 = vpack.c.bf16 %v516_v56, %v514_v55 }
  0xa8   : > { %1147 = vmatmul.mubr.bf16.gmra.mrb[20].mxu1 %v539_v21 }
  0xa9   : > { %1154 = vmatprep.mubr.bf16.mxu1 %v542_v22 }
  0xad   : > { %934 = vmatmul.mubr.bf16.gmra.mrb[8].mxu0 %v533_v2  ;;  %v519_v2 = vld [vmem:[#allocation2 + $0x1b0] sm:$0xff] }
  0xae   : > { %943 = vmatprep.mubr.bf16.mxu0 %v536_v3  ;;  %v522_v3 = vld [vmem:[#allocation2 + $0x1c8] sm:$0xff]  ;;  %v555_v5 = vpack.c.bf16 %v519_v2, %v517_v1 }
  0xaf   : > { %v558_v6 = vpack.c.bf16 %v524_v4, %v522_v3 }
  0xb0   : > { %1155 = vmatmul.mubr.bf16.gmra.mrb[24].mxu1 %v541_v27 }
  0xb1   : > { %1162 = vmatprep.mubr.bf16.mxu1 %v544_v28 }
  0xb5   : > { %944 = vmatmul.mubr.bf16.gmra.mrb[12].mxu0 %v535_v9  ;;  %v526_v9 = vld [vmem:[#allocation2 + $0x1e8] sm:$0xff] }
  0xb6   : > { %953 = vmatprep.mubr.bf16.mxu0 %v538_v10  ;;  %v528_v10 = vld [vmem:[#allocation2 + $0x1f8] sm:$0xff] }
  0xb7   : > { %v560_v12 = vpack.c.bf16 %v528_v10, %v526_v9 }
  0xb8   : > { %1163 = vmatmul.mubr.bf16.gmra.mrb[28].mxu1 %v543_v33 }
  0xb9   : > { %1170 = vmatprep.mubr.bf16.mxu1 %v546_v34 }
  0xbd   : > { %954 = vmatmul.mubr.bf16.gmra.mrb[16].mxu0 %v537_v15  ;;  %v559_v15 = vpack.c.bf16 %v527_v14, %v525_v13 }
  0xbe   : > { %963 = vmatprep.mubr.bf16.mxu0 %v540_v16  ;;  %v1528_v16 = vlaneseq }
  0xc0   : > { %1171 = vmatmul.mubr.bf16.gmra.mrb[32].mxu1 %v545_v39  ;;  %v1529_v17 = vshrl.u32 %v1528_v16, 7 }
  0xc1   : > { %1178 = vmatprep.mubr.bf16.mxu1 %v548_v40 }
  0xc2   : > { %v1538_v18 = vsub.s32 2, %v1529_v17  ;;  %v1530_v36 = vsub.s32 0, %v1529_v17 }
  0xc4   : > { %v2595_v23 = vrot.slane %v1526_v19, %v1538_v18  ;;  %v2607_v44 = vrot.slane %v1526_v19, %v1530_v36 }
  0xc5   : > { %964 = vmatmul.mubr.bf16.gmra.mrb[20].mxu0 %v539_v21 }
  0xc6   : > { %973 = vmatprep.mubr.bf16.mxu0 %v542_v22 }
  0xc8   : > { %1179 = vmatmul.mubr.bf16.gmra.mrb[36].mxu1 %v547_v45 }
  0xc9   : > { %1186 = vmatprep.mubr.bf16.mxu1 %v550_v46 }
  0xcd   : > { %974 = vmatmul.mubr.bf16.gmra.mrb[24].mxu0 %v541_v27 }
  0xce   : > { %983 = vmatprep.mubr.bf16.mxu0 %v544_v28 }
  0xd0   : > { %1187 = vmatmul.mubr.bf16.gmra.mrb[40].mxu1 %v549_v51 }
  0xd1   : > { %1194 = vmatprep.mubr.bf16.mxu1 %v552_v52 }
  0xd5   : > { %984 = vmatmul.mubr.bf16.gmra.mrb[28].mxu0 %v543_v33 }
  0xd6   : > { %993 = vmatprep.mubr.bf16.mxu0 %v546_v34 }
  0xd8   : > { %1195 = vmatmul.mubr.bf16.gmra.mrb[44].mxu1 %v551_v57 }
  0xd9   : > { %1202 = vmatprep.mubr.bf16.mxu1 %v554_v58 }
  0xdd   : > { %994 = vmatmul.mubr.bf16.gmra.mrb[32].mxu0 %v545_v39  ;;  %v1534_v39 = vsub.s32 1, %v1529_v17 }
  0xde   : > { %1003 = vmatprep.mubr.bf16.mxu0 %v548_v40 }
  0xdf   : > { %v2609_v47 = vrot.slane %v1526_v19, %v1534_v39 }
  0xe0   : > { %1203 = vmatmul.mubr.bf16.gmra.mrb[48].mxu1 %v553_v63 }
  0xe1   : > { %1210 = vmatprep.mubr.bf16.mxu1 %v556_v0 }
  0xe5   : > { %1004 = vmatmul.mubr.bf16.gmra.mrb[36].mxu0 %v547_v45 }
  0xe6   : > { %1013 = vmatprep.mubr.bf16.mxu0 %v550_v46 }
  0xe8   : > { %1211 = vmatmul.mubr.bf16.gmra.mrb[52].mxu1 %v555_v5 }
  0xe9   : > { %1218 = vmatprep.mubr.bf16.mxu1 %v558_v6 }
  0xed   : > { %1014 = vmatmul.mubr.bf16.gmra.mrb[40].mxu0 %v549_v51 }
  0xee   : > { %1023 = vmatprep.mubr.bf16.mxu0 %v552_v52 }
  0xf0   : > { %1219 = vmatmul.mubr.bf16.gmra.mrb[56].mxu1 %v557_v11 }
  0xf1   : > { %1226 = vmatprep.mubr.bf16.mxu1 %v560_v12 }
  0xf5   : > { %1024 = vmatmul.mubr.bf16.gmra.mrb[44].mxu0 %v551_v57 }
  0xf6   : > { %1033 = vmatprep.mubr.bf16.mxu0 %v554_v58 }
  0xf8   : > { %1227 = vmatmul.mubr.bf16.gmra.mrb[60].mxu1 %v559_v15 }
  0xfd   : > { %1034 = vmatmul.mubr.bf16.gmra.mrb[48].mxu0 %v553_v63 }
  0xfe   : > { %1043 = vmatprep.mubr.bf16.mxu0 %v556_v0 }
 0x105   : > { %1044 = vmatmul.mubr.bf16.gmra.mrb[52].mxu0 %v555_v5 }
 0x106   : > { %1053 = vmatprep.mubr.bf16.mxu0 %v558_v6 }
 0x10d   : > { %1054 = vmatmul.mubr.bf16.gmra.mrb[56].mxu0 %v557_v11 }
 0x10e   : > { %1063 = vmatprep.mubr.bf16.mxu0 %v560_v12 }
 0x115   : > { %1064 = vmatmul.mubr.bf16.gmra.mrb[60].mxu0 %v559_v15 }
 0x153   : > { %v1945_v20 = vpop.f32.mrb[0].mxu1 }
 0x154   : > { %v1946_v21 = vpop.f32.mrb[1].mxu1 }
 0x155   : > { %v1947_v22 = vadd.f32 %v1946_v21, %v1945_v20  ;;  %v1948_v24 = vpop.f32.mrb[2].mxu1 }
 0x156   : > { %v1949_v25 = vpop.f32.mrb[3].mxu1 }
 0x157   : > { %v1950_v26 = vadd.f32 %v1949_v25, %v1948_v24  ;;  %v1545_v27 = vadd.f32 %v1947_v22, %v2595_v23 }
 0x159   : > { %1641 = vst [vmem:[%s2598_s29 + $0x10] sm:$0xff] %v1545_v27  ;;  %v1548_v28 = vadd.f32 %v1950_v26, %v2595_v23 }
 0x15b   : > { %v1951_v29 = vpop.f32.mrb[4].mxu1  ;;  %1644 = vst [vmem:[%s2598_s29 + $0x28] sm:$0xff] %v1548_v28 }
 0x15c   : > { %v1952_v30 = vpop.f32.mrb[5].mxu1 }
 0x15d   : > { %v1953_v31 = vadd.f32 %v1952_v30, %v1951_v29  ;;  %v1954_v32 = vpop.f32.mrb[6].mxu1 }
 0x15e   : > { %v1955_v33 = vpop.f32.mrb[7].mxu1 }
 0x15f   : > { %v1956_v34 = vadd.f32 %v1955_v33, %v1954_v32  ;;  %v1551_v35 = vadd.f32 %v1953_v31, %v2595_v23 }
 0x161   : > { %1647 = vst [vmem:[%s2598_s29 + $0x40] sm:$0xff] %v1551_v35  ;;  %v1554_v37 = vadd.f32 %v1956_v34, %v2595_v23 }
 0x163   : > { %v1957_v38 = vpop.f32.mrb[8].mxu1  ;;  %1650 = vst [vmem:[%s2598_s29 + $0x58] sm:$0xff] %v1554_v37 }
 0x164   : > { %v1958_v40 = vpop.f32.mrb[9].mxu1 }
 0x165   : > { %v1959_v41 = vadd.f32 %v1958_v40, %v1957_v38  ;;  %v1960_v42 = vpop.f32.mrb[10].mxu1 }
 0x166   : > { %v1961_v43 = vpop.f32.mrb[11].mxu1 }
 0x167   : > { %v1962_v45 = vadd.f32 %v1961_v43, %v1960_v42  ;;  %v1557_v49 = vadd.f32 %v1959_v41, %v2595_v23 }
 0x169   : > { %1653 = vst [vmem:[%s2598_s29 + $0x70] sm:$0xff] %v1557_v49  ;;  %v1560_v53 = vadd.f32 %v1962_v45, %v2595_v23 }
 0x16b   : > { %v1963_v54 = vpop.f32.mrb[12].mxu1  ;;  %1656 = vst [vmem:[%s2598_s29 + $0x88] sm:$0xff] %v1560_v53 }
 0x16c   : > { %v1964_v56 = vpop.f32.mrb[13].mxu1 }
 0x16d   : > { %v1965_v58 = vadd.f32 %v1964_v56, %v1963_v54  ;;  %v1966_v59 = vpop.f32.mrb[14].mxu1 }
 0x16e   : > { %v1967_v61 = vpop.f32.mrb[15].mxu1 }
 0x16f   : > { %v1968_v62 = vadd.f32 %v1967_v61, %v1966_v59  ;;  %v1563_v1 = vadd.f32 %v1965_v58, %v2595_v23 }
 0x170   : > { %v915_v46 = vpop.f32.mrb[0].mxu0 }
 0x171   : > { %v917_v48 = vpop.f32.mrb[1].mxu0  ;;  %v1543_v51 = vadd.f32 %v2607_v44, %v915_v46  ;;  %1659 = vst [vmem:[%s2598_s29 + $0xa0] sm:$0xff] %v1563_v1  ;;  %v1566_v5 = vadd.f32 %v1968_v62, %v2595_v23 }
 0x172   : > { %v919_v50 = vpop.f32.mrb[2].mxu0  ;;  %v1544_v55 = vadd.f32 %v2609_v47, %v917_v48 }
 0x173   : > { %v921_v52 = vpop.f32.mrb[3].mxu0  ;;  %1639 = vst [vmem:[%s2598_s29] sm:$0xff] %v1543_v51  ;;  %v1546_v57 = vadd.f32 %v2607_v44, %v919_v50  ;;  %v1969_v6 = vpop.f32.mrb[16].mxu1  ;;  %1662 = vst [vmem:[%s2598_s29 + $0xb8] sm:$0xff] %v1566_v5 }
 0x174   : > { %1640 = vst [vmem:[%s2598_s29 + $0x8] sm:$0xff] %v1544_v55  ;;  %v1547_v60 = vadd.f32 %v2609_v47, %v921_v52  ;;  %v1970_v8 = vpop.f32.mrb[17].mxu1 }
 0x175   : > { %1642 = vst [vmem:[%s2598_s29 + $0x18] sm:$0xff] %v1546_v57  ;;  %v1971_v10 = vadd.f32 %v1970_v8, %v1969_v6  ;;  %v1972_v11 = vpop.f32.mrb[18].mxu1 }
 0x176   : > { %1643 = vst [vmem:[%s2598_s29 + $0x20] sm:$0xff] %v1547_v60  ;;  %v1973_v13 = vpop.f32.mrb[19].mxu1 }
 0x177   : > { %v1974_v14 = vadd.f32 %v1973_v13, %v1972_v11  ;;  %v1569_v17 = vadd.f32 %v1971_v10, %v2595_v23 }
 0x178   : > { %v925_v63 = vpop.f32.mrb[4].mxu0 }
 0x179   : > { %v927_v0 = vpop.f32.mrb[5].mxu0  ;;  %v1549_v3 = vadd.f32 %v2607_v44, %v925_v63  ;;  %1665 = vst [vmem:[%s2598_s29 + $0xd0] sm:$0xff] %v1569_v17  ;;  %v1572_v21 = vadd.f32 %v1974_v14, %v2595_v23 }
 0x17a   : > { %v929_v2 = vpop.f32.mrb[6].mxu0  ;;  %v1550_v7 = vadd.f32 %v2609_v47, %v927_v0 }
 0x17b   : > { %v931_v4 = vpop.f32.mrb[7].mxu0  ;;  %1645 = vst [vmem:[%s2598_s29 + $0x30] sm:$0xff] %v1549_v3  ;;  %v1552_v9 = vadd.f32 %v2607_v44, %v929_v2  ;;  %v1975_v22 = vpop.f32.mrb[20].mxu1  ;;  %1668 = vst [vmem:[%s2598_s29 + $0xe8] sm:$0xff] %v1572_v21 }
 0x17c   : > { %1646 = vst [vmem:[%s2598_s29 + $0x38] sm:$0xff] %v1550_v7  ;;  %v1553_v12 = vadd.f32 %v2609_v47, %v931_v4  ;;  %v1976_v25 = vpop.f32.mrb[21].mxu1 }
 0x17d   : > { %1648 = vst [vmem:[%s2598_s29 + $0x48] sm:$0xff] %v1552_v9  ;;  %v1977_v27 = vadd.f32 %v1976_v25, %v1975_v22  ;;  %v1978_v28 = vpop.f32.mrb[22].mxu1 }
 0x17e   : > { %1649 = vst [vmem:[%s2598_s29 + $0x50] sm:$0xff] %v1553_v12  ;;  %v1979_v30 = vpop.f32.mrb[23].mxu1 }
 0x17f   : > { %v1980_v31 = vadd.f32 %v1979_v30, %v1978_v28  ;;  %v1575_v34 = vadd.f32 %v1977_v27, %v2595_v23 }
 0x180   : > { %v935_v15 = vpop.f32.mrb[8].mxu0 }
 0x181   : > { %v937_v16 = vpop.f32.mrb[9].mxu0  ;;  %v1555_v19 = vadd.f32 %v2607_v44, %v935_v15  ;;  %1671 = vst [vmem:[%s2598_s29 + $0x100] sm:$0xff] %v1575_v34  ;;  %v1578_v38 = vadd.f32 %v1980_v31, %v2595_v23 }
 0x182   : > { %v939_v18 = vpop.f32.mrb[10].mxu0  ;;  %v1556_v24 = vadd.f32 %v2609_v47, %v937_v16 }
 0x183   : > { %v941_v20 = vpop.f32.mrb[11].mxu0  ;;  %1651 = vst [vmem:[%s2598_s29 + $0x60] sm:$0xff] %v1555_v19  ;;  %v1558_v26 = vadd.f32 %v2607_v44, %v939_v18  ;;  %v1981_v39 = vpop.f32.mrb[24].mxu1  ;;  %1674 = vst [vmem:[%s2598_s29 + $0x118] sm:$0xff] %v1578_v38 }
 0x184   : > { %1652 = vst [vmem:[%s2598_s29 + $0x68] sm:$0xff] %v1556_v24  ;;  %v1559_v29 = vadd.f32 %v2609_v47, %v941_v20  ;;  %v1982_v41 = vpop.f32.mrb[25].mxu1 }
 0x185   : > { %1654 = vst [vmem:[%s2598_s29 + $0x78] sm:$0xff] %v1558_v26  ;;  %v1983_v43 = vadd.f32 %v1982_v41, %v1981_v39  ;;  %v1984_v45 = vpop.f32.mrb[26].mxu1 }
 0x186   : > { %1655 = vst [vmem:[%s2598_s29 + $0x80] sm:$0xff] %v1559_v29  ;;  %v1985_v48 = vpop.f32.mrb[27].mxu1 }
 0x187   : > { %v1986_v49 = vadd.f32 %v1985_v48, %v1984_v45  ;;  %v1581_v52 = vadd.f32 %v1983_v43, %v2595_v23 }
 0x188   : > { %v945_v32 = vpop.f32.mrb[12].mxu0 }
 0x189   : > { %v947_v33 = vpop.f32.mrb[13].mxu0  ;;  %v1561_v36 = vadd.f32 %v2607_v44, %v945_v32  ;;  %1677 = vst [vmem:[%s2598_s29 + $0x130] sm:$0xff] %v1581_v52  ;;  %v1584_v56 = vadd.f32 %v1986_v49, %v2595_v23 }
 0x18a   : > { %v949_v35 = vpop.f32.mrb[14].mxu0  ;;  %v1562_v40 = vadd.f32 %v2609_v47, %v947_v33 }
 0x18b   : > { %v951_v37 = vpop.f32.mrb[15].mxu0  ;;  %1657 = vst [vmem:[%s2598_s29 + $0x90] sm:$0xff] %v1561_v36  ;;  %v1564_v42 = vadd.f32 %v2607_v44, %v949_v35  ;;  %v1987_v57 = vpop.f32.mrb[28].mxu1  ;;  %1680 = vst [vmem:[%s2598_s29 + $0x148] sm:$0xff] %v1584_v56 }
 0x18c   : > { %1658 = vst [vmem:[%s2598_s29 + $0x98] sm:$0xff] %v1562_v40  ;;  %v1565_v46 = vadd.f32 %v2609_v47, %v951_v37  ;;  %v1988_v59 = vpop.f32.mrb[29].mxu1 }
 0x18d   : > { %1660 = vst [vmem:[%s2598_s29 + $0xa8] sm:$0xff] %v1564_v42  ;;  %v1989_v61 = vadd.f32 %v1988_v59, %v1987_v57  ;;  %v1990_v62 = vpop.f32.mrb[30].mxu1 }
 0x18e   : > { %1661 = vst [vmem:[%s2598_s29 + $0xb0] sm:$0xff] %v1565_v46  ;;  %v1991_v0 = vpop.f32.mrb[31].mxu1 }
 0x18f   : > { %v1992_v1 = vadd.f32 %v1991_v0, %v1990_v62  ;;  %v1587_v4 = vadd.f32 %v1989_v61, %v2595_v23 }
 0x190   : > { %v955_v50 = vpop.f32.mrb[16].mxu0 }
 0x191   : > { %v957_v51 = vpop.f32.mrb[17].mxu0  ;;  %v1567_v54 = vadd.f32 %v2607_v44, %v955_v50  ;;  %1683 = vst [vmem:[%s2598_s29 + $0x160] sm:$0xff] %v1587_v4  ;;  %v1590_v8 = vadd.f32 %v1992_v1, %v2595_v23 }
 0x192   : > { %v959_v53 = vpop.f32.mrb[18].mxu0  ;;  %v1568_v58 = vadd.f32 %v2609_v47, %v957_v51 }
 0x193   : > { %v961_v55 = vpop.f32.mrb[19].mxu0  ;;  %1663 = vst [vmem:[%s2598_s29 + $0xc0] sm:$0xff] %v1567_v54  ;;  %v1570_v60 = vadd.f32 %v2607_v44, %v959_v53  ;;  %v1993_v9 = vpop.f32.mrb[32].mxu1  ;;  %1686 = vst [vmem:[%s2598_s29 + $0x178] sm:$0xff] %v1590_v8 }
 0x194   : > { %1664 = vst [vmem:[%s2598_s29 + $0xc8] sm:$0xff] %v1568_v58  ;;  %v1571_v63 = vadd.f32 %v2609_v47, %v961_v55  ;;  %v1994_v11 = vpop.f32.mrb[33].mxu1 }
 0x195   : > { %1666 = vst [vmem:[%s2598_s29 + $0xd8] sm:$0xff] %v1570_v60  ;;  %v1995_v13 = vadd.f32 %v1994_v11, %v1993_v9  ;;  %v1996_v14 = vpop.f32.mrb[34].mxu1 }
 0x196   : > { %1667 = vst [vmem:[%s2598_s29 + $0xe0] sm:$0xff] %v1571_v63  ;;  %v1997_v16 = vpop.f32.mrb[35].mxu1 }
 0x197   : > { %v1998_v17 = vadd.f32 %v1997_v16, %v1996_v14  ;;  %v1593_v20 = vadd.f32 %v1995_v13, %v2595_v23 }
 0x198   : > { %v965_v2 = vpop.f32.mrb[20].mxu0 }
 0x199   : > { %v967_v3 = vpop.f32.mrb[21].mxu0  ;;  %v1573_v6 = vadd.f32 %v2607_v44, %v965_v2  ;;  %1689 = vst [vmem:[%s2598_s29 + $0x190] sm:$0xff] %v1593_v20  ;;  %v1596_v25 = vadd.f32 %v1998_v17, %v2595_v23 }
 0x19a   : > { %v969_v5 = vpop.f32.mrb[22].mxu0  ;;  %v1574_v10 = vadd.f32 %v2609_v47, %v967_v3 }
 0x19b   : > { %v971_v7 = vpop.f32.mrb[23].mxu0  ;;  %1669 = vst [vmem:[%s2598_s29 + $0xf0] sm:$0xff] %v1573_v6  ;;  %v1576_v12 = vadd.f32 %v2607_v44, %v969_v5  ;;  %v1999_v26 = vpop.f32.mrb[36].mxu1  ;;  %1692 = vst [vmem:[%s2598_s29 + $0x1a8] sm:$0xff] %v1596_v25 }
 0x19c   : > { %1670 = vst [vmem:[%s2598_s29 + $0xf8] sm:$0xff] %v1574_v10  ;;  %v1577_v15 = vadd.f32 %v2609_v47, %v971_v7  ;;  %v2000_v28 = vpop.f32.mrb[37].mxu1 }
 0x19d   : > { %1672 = vst [vmem:[%s2598_s29 + $0x108] sm:$0xff] %v1576_v12  ;;  %v2001_v30 = vadd.f32 %v2000_v28, %v1999_v26  ;;  %v2002_v31 = vpop.f32.mrb[38].mxu1 }
 0x19e   : > { %1673 = vst [vmem:[%s2598_s29 + $0x110] sm:$0xff] %v1577_v15  ;;  %v2003_v33 = vpop.f32.mrb[39].mxu1 }
 0x19f   : > { %v2004_v34 = vadd.f32 %v2003_v33, %v2002_v31  ;;  %v1599_v37 = vadd.f32 %v2001_v30, %v2595_v23 }
 0x1a0   : > { %v975_v18 = vpop.f32.mrb[24].mxu0 }
 0x1a1   : > { %v977_v19 = vpop.f32.mrb[25].mxu0  ;;  %v1579_v22 = vadd.f32 %v2607_v44, %v975_v18  ;;  %1695 = vst [vmem:[%s2598_s29 + $0x1c0] sm:$0xff] %v1599_v37  ;;  %v1602_v41 = vadd.f32 %v2004_v34, %v2595_v23 }
 0x1a2   : > { %v979_v21 = vpop.f32.mrb[26].mxu0  ;;  %v1580_v27 = vadd.f32 %v2609_v47, %v977_v19 }
 0x1a3   : > { %v981_v24 = vpop.f32.mrb[27].mxu0  ;;  %1675 = vst [vmem:[%s2598_s29 + $0x120] sm:$0xff] %v1579_v22  ;;  %v1582_v29 = vadd.f32 %v2607_v44, %v979_v21  ;;  %v2005_v42 = vpop.f32.mrb[40].mxu1  ;;  %1698 = vst [vmem:[%s2598_s29 + $0x1d8] sm:$0xff] %v1602_v41 }
 0x1a4   : > { %1676 = vst [vmem:[%s2598_s29 + $0x128] sm:$0xff] %v1580_v27  ;;  %v1583_v32 = vadd.f32 %v2609_v47, %v981_v24  ;;  %v2006_v45 = vpop.f32.mrb[41].mxu1 }
 0x1a5   : > { %1678 = vst [vmem:[%s2598_s29 + $0x138] sm:$0xff] %v1582_v29  ;;  %v2007_v48 = vadd.f32 %v2006_v45, %v2005_v42  ;;  %v2008_v49 = vpop.f32.mrb[42].mxu1 }
 0x1a6   : > { %1679 = vst [vmem:[%s2598_s29 + $0x140] sm:$0xff] %v1583_v32  ;;  %v2009_v51 = vpop.f32.mrb[43].mxu1 }
 0x1a7   : > { %v2010_v52 = vadd.f32 %v2009_v51, %v2008_v49  ;;  %v1605_v55 = vadd.f32 %v2007_v48, %v2595_v23 }
 0x1a8   : > { %v985_v35 = vpop.f32.mrb[28].mxu0 }
 0x1a9   : > { %v987_v36 = vpop.f32.mrb[29].mxu0  ;;  %v1585_v39 = vadd.f32 %v2607_v44, %v985_v35  ;;  %1701 = vst [vmem:[%s2598_s29 + $0x1f0] sm:$0xff] %v1605_v55  ;;  %v1608_v59 = vadd.f32 %v2010_v52, %v2595_v23 }
 0x1aa   : > { %v989_v38 = vpop.f32.mrb[30].mxu0  ;;  %v1586_v43 = vadd.f32 %v2609_v47, %v987_v36 }
 0x1ab   : > { %v991_v40 = vpop.f32.mrb[31].mxu0  ;;  %1681 = vst [vmem:[%s2598_s29 + $0x150] sm:$0xff] %v1585_v39  ;;  %v1588_v46 = vadd.f32 %v2607_v44, %v989_v38  ;;  %v2011_v60 = vpop.f32.mrb[44].mxu1  ;;  %1704 = vst [vmem:[%s2598_s29 + $0x208] sm:$0xff] %v1608_v59 }
 0x1ac   : > { %1682 = vst [vmem:[%s2598_s29 + $0x158] sm:$0xff] %v1586_v43  ;;  %v1589_v50 = vadd.f32 %v2609_v47, %v991_v40  ;;  %v2012_v62 = vpop.f32.mrb[45].mxu1 }
 0x1ad   : > { %1684 = vst [vmem:[%s2598_s29 + $0x168] sm:$0xff] %v1588_v46  ;;  %v2013_v0 = vadd.f32 %v2012_v62, %v2011_v60  ;;  %v2014_v1 = vpop.f32.mrb[46].mxu1 }
 0x1ae   : > { %1685 = vst [vmem:[%s2598_s29 + $0x170] sm:$0xff] %v1589_v50  ;;  %v2015_v3 = vpop.f32.mrb[47].mxu1 }
 0x1af   : > { %v2016_v4 = vadd.f32 %v2015_v3, %v2014_v1  ;;  %v1611_v7 = vadd.f32 %v2013_v0, %v2595_v23 }
 0x1b0   : > { %v995_v53 = vpop.f32.mrb[32].mxu0 }
 0x1b1   : > { %v997_v54 = vpop.f32.mrb[33].mxu0  ;;  %v1591_v57 = vadd.f32 %v2607_v44, %v995_v53  ;;  %1707 = vst [vmem:[%s2598_s29 + $0x220] sm:$0xff] %v1611_v7  ;;  %v1614_v11 = vadd.f32 %v2016_v4, %v2595_v23 }
 0x1b2   : > { %v999_v56 = vpop.f32.mrb[34].mxu0  ;;  %v1592_v61 = vadd.f32 %v2609_v47, %v997_v54 }
 0x1b3   : > { %v1001_v58 = vpop.f32.mrb[35].mxu0  ;;  %1687 = vst [vmem:[%s2598_s29 + $0x180] sm:$0xff] %v1591_v57  ;;  %v1594_v63 = vadd.f32 %v2607_v44, %v999_v56  ;;  %v2017_v12 = vpop.f32.mrb[48].mxu1  ;;  %1710 = vst [vmem:[%s2598_s29 + $0x238] sm:$0xff] %v1614_v11 }
 0x1b4   : > { %1688 = vst [vmem:[%s2598_s29 + $0x188] sm:$0xff] %v1592_v61  ;;  %v1595_v2 = vadd.f32 %v2609_v47, %v1001_v58  ;;  %v2018_v14 = vpop.f32.mrb[49].mxu1 }
 0x1b5   : > { %1690 = vst [vmem:[%s2598_s29 + $0x198] sm:$0xff] %v1594_v63  ;;  %v2019_v16 = vadd.f32 %v2018_v14, %v2017_v12  ;;  %v2020_v17 = vpop.f32.mrb[50].mxu1 }
 0x1b6   : > { %1691 = vst [vmem:[%s2598_s29 + $0x1a0] sm:$0xff] %v1595_v2  ;;  %v2021_v19 = vpop.f32.mrb[51].mxu1 }
 0x1b7   : > { %v2022_v20 = vadd.f32 %v2021_v19, %v2020_v17  ;;  %v1617_v24 = vadd.f32 %v2019_v16, %v2595_v23 }
 0x1b8   : > { %v1005_v5 = vpop.f32.mrb[36].mxu0 }
 0x1b9   : > { %v1007_v6 = vpop.f32.mrb[37].mxu0  ;;  %v1597_v9 = vadd.f32 %v2607_v44, %v1005_v5  ;;  %1713 = vst [vmem:[%s2598_s29 + $0x250] sm:$0xff] %v1617_v24  ;;  %v1620_v28 = vadd.f32 %v2022_v20, %v2595_v23 }
 0x1ba   : > { %v1009_v8 = vpop.f32.mrb[38].mxu0  ;;  %v1598_v13 = vadd.f32 %v2609_v47, %v1007_v6 }
 0x1bb   : > { %v1011_v10 = vpop.f32.mrb[39].mxu0  ;;  %1693 = vst [vmem:[%s2598_s29 + $0x1b0] sm:$0xff] %v1597_v9  ;;  %v1600_v15 = vadd.f32 %v2607_v44, %v1009_v8  ;;  %v2023_v29 = vpop.f32.mrb[52].mxu1  ;;  %1716 = vst [vmem:[%s2598_s29 + $0x268] sm:$0xff] %v1620_v28 }
 0x1bc   : > { %1694 = vst [vmem:[%s2598_s29 + $0x1b8] sm:$0xff] %v1598_v13  ;;  %v1601_v18 = vadd.f32 %v2609_v47, %v1011_v10  ;;  %v2024_v31 = vpop.f32.mrb[53].mxu1 }
 0x1bd   : > { %1696 = vst [vmem:[%s2598_s29 + $0x1c8] sm:$0xff] %v1600_v15  ;;  %v2025_v33 = vadd.f32 %v2024_v31, %v2023_v29  ;;  %v2026_v34 = vpop.f32.mrb[54].mxu1 }
 0x1be   : > { %1697 = vst [vmem:[%s2598_s29 + $0x1d0] sm:$0xff] %v1601_v18  ;;  %v2027_v36 = vpop.f32.mrb[55].mxu1 }
 0x1bf   : > { %v2028_v37 = vadd.f32 %v2027_v36, %v2026_v34  ;;  %v1623_v40 = vadd.f32 %v2025_v33, %v2595_v23 }
 0x1c0   : > { %v1015_v21 = vpop.f32.mrb[40].mxu0 }
 0x1c1   : > { %v1017_v22 = vpop.f32.mrb[41].mxu0  ;;  %v1603_v26 = vadd.f32 %v2607_v44, %v1015_v21  ;;  %1719 = vst [vmem:[%s2598_s29 + $0x280] sm:$0xff] %v1623_v40  ;;  %v1626_v45 = vadd.f32 %v2028_v37, %v2595_v23 }
 0x1c2   : > { %v1019_v25 = vpop.f32.mrb[42].mxu0  ;;  %v1604_v30 = vadd.f32 %v2609_v47, %v1017_v22 }
 0x1c3   : > { %v1021_v27 = vpop.f32.mrb[43].mxu0  ;;  %1699 = vst [vmem:[%s2598_s29 + $0x1e0] sm:$0xff] %v1603_v26  ;;  %v1606_v32 = vadd.f32 %v2607_v44, %v1019_v25  ;;  %v2029_v46 = vpop.f32.mrb[56].mxu1  ;;  %1722 = vst [vmem:[%s2598_s29 + $0x298] sm:$0xff] %v1626_v45 }
 0x1c4   : > { %1700 = vst [vmem:[%s2598_s29 + $0x1e8] sm:$0xff] %v1604_v30  ;;  %v1607_v35 = vadd.f32 %v2609_v47, %v1021_v27  ;;  %v2030_v49 = vpop.f32.mrb[57].mxu1 }
 0x1c5   : > { %1702 = vst [vmem:[%s2598_s29 + $0x1f8] sm:$0xff] %v1606_v32  ;;  %v2031_v51 = vadd.f32 %v2030_v49, %v2029_v46  ;;  %v2032_v52 = vpop.f32.mrb[58].mxu1 }
 0x1c6   : > { %1703 = vst [vmem:[%s2598_s29 + $0x200] sm:$0xff] %v1607_v35  ;;  %v2033_v54 = vpop.f32.mrb[59].mxu1 }
 0x1c7   : > { %v2034_v55 = vadd.f32 %v2033_v54, %v2032_v52  ;;  %v1629_v58 = vadd.f32 %v2031_v51, %v2595_v23 }
 0x1c8   : > { %v1025_v38 = vpop.f32.mrb[44].mxu0 }
 0x1c9   : > { %v1027_v39 = vpop.f32.mrb[45].mxu0  ;;  %v1609_v42 = vadd.f32 %v2607_v44, %v1025_v38  ;;  %1725 = vst [vmem:[%s2598_s29 + $0x2b0] sm:$0xff] %v1629_v58  ;;  %v1632_v62 = vadd.f32 %v2034_v55, %v2595_v23 }
 0x1ca   : > { %v1029_v41 = vpop.f32.mrb[46].mxu0  ;;  %v1610_v48 = vadd.f32 %v2609_v47, %v1027_v39 }
 0x1cb   : > { %v1031_v43 = vpop.f32.mrb[47].mxu0  ;;  %1705 = vst [vmem:[%s2598_s29 + $0x210] sm:$0xff] %v1609_v42  ;;  %v1612_v50 = vadd.f32 %v2607_v44, %v1029_v41  ;;  %v2035_v63 = vpop.f32.mrb[60].mxu1  ;;  %1728 = vst [vmem:[%s2598_s29 + $0x2c8] sm:$0xff] %v1632_v62 }
 0x1cc   : > { %1706 = vst [vmem:[%s2598_s29 + $0x218] sm:$0xff] %v1610_v48  ;;  %v1613_v53 = vadd.f32 %v2609_v47, %v1031_v43  ;;  %v2036_v1 = vpop.f32.mrb[61].mxu1 }
 0x1cd   : > { %1708 = vst [vmem:[%s2598_s29 + $0x228] sm:$0xff] %v1612_v50  ;;  %v2037_v3 = vadd.f32 %v2036_v1, %v2035_v63  ;;  %v2038_v4 = vpop.f32.mrb[62].mxu1 }
 0x1ce   : > { %1709 = vst [vmem:[%s2598_s29 + $0x230] sm:$0xff] %v1613_v53  ;;  %v2039_v6 = vpop.f32.mrb[63].mxu1 }
 0x1cf   : > { %v2040_v7 = vadd.f32 %v2039_v6, %v2038_v4  ;;  %v1635_v10 = vadd.f32 %v2037_v3, %v2595_v23 }
 0x1d0   : > { %v1035_v56 = vpop.f32.mrb[48].mxu0 }
 0x1d1   : > { %v1037_v57 = vpop.f32.mrb[49].mxu0  ;;  %v1615_v60 = vadd.f32 %v2607_v44, %v1035_v56  ;;  %1731 = vst [vmem:[%s2598_s29 + $0x2e0] sm:$0xff] %v1635_v10  ;;  %v1638_v14 = vadd.f32 %v2040_v7, %v2595_v23 }
 0x1d2   : > { %v1039_v59 = vpop.f32.mrb[50].mxu0  ;;  %v1616_v0 = vadd.f32 %v2609_v47, %v1037_v57 }
 0x1d3   : > { %v1041_v61 = vpop.f32.mrb[51].mxu0  ;;  %1711 = vst [vmem:[%s2598_s29 + $0x240] sm:$0xff] %v1615_v60  ;;  %v1618_v2 = vadd.f32 %v2607_v44, %v1039_v59  ;;  %1734 = vst [vmem:[%s2598_s29 + $0x2f8] sm:$0xff] %v1638_v14 }
 0x1d4   : > { %1712 = vst [vmem:[%s2598_s29 + $0x248] sm:$0xff] %v1616_v0  ;;  %v1619_v5 = vadd.f32 %v2609_v47, %v1041_v61 }
 0x1d5   : > { %1714 = vst [vmem:[%s2598_s29 + $0x258] sm:$0xff] %v1618_v2 }
 0x1d6   : > { %1715 = vst [vmem:[%s2598_s29 + $0x260] sm:$0xff] %v1619_v5 }
 0x1d8   : > { %v1045_v8 = vpop.f32.mrb[52].mxu0 }
 0x1d9   : > { %v1047_v9 = vpop.f32.mrb[53].mxu0  ;;  %v1621_v12 = vadd.f32 %v2607_v44, %v1045_v8 }
 0x1da   : > { %v1049_v11 = vpop.f32.mrb[54].mxu0  ;;  %v1622_v15 = vadd.f32 %v2609_v47, %v1047_v9 }
 0x1db   : > { %v1051_v13 = vpop.f32.mrb[55].mxu0  ;;  %1717 = vst [vmem:[%s2598_s29 + $0x270] sm:$0xff] %v1621_v12  ;;  %v1624_v16 = vadd.f32 %v2607_v44, %v1049_v11 }
 0x1dc   : > { %1718 = vst [vmem:[%s2598_s29 + $0x278] sm:$0xff] %v1622_v15  ;;  %v1625_v17 = vadd.f32 %v2609_v47, %v1051_v13 }
 0x1dd   : > { %1720 = vst [vmem:[%s2598_s29 + $0x288] sm:$0xff] %v1624_v16 }
 0x1de   : > { %1721 = vst [vmem:[%s2598_s29 + $0x290] sm:$0xff] %v1625_v17 }
 0x1e0   : > { %v1055_v18 = vpop.f32.mrb[56].mxu0 }
 0x1e1   : > { %v1057_v19 = vpop.f32.mrb[57].mxu0  ;;  %v1627_v23 = vadd.f32 %v2607_v44, %v1055_v18 }
 0x1e2   : > { %v1059_v20 = vpop.f32.mrb[58].mxu0  ;;  %v1628_v22 = vadd.f32 %v2609_v47, %v1057_v19 }
 0x1e3   : > { %v1061_v21 = vpop.f32.mrb[59].mxu0  ;;  %1723 = vst [vmem:[%s2598_s29 + $0x2a0] sm:$0xff] %v1627_v23  ;;  %v1630_v24 = vadd.f32 %v2607_v44, %v1059_v20 }
 0x1e4   : > { %1724 = vst [vmem:[%s2598_s29 + $0x2a8] sm:$0xff] %v1628_v22  ;;  %v1631_v25 = vadd.f32 %v2609_v47, %v1061_v21 }
 0x1e5   : > { %1726 = vst [vmem:[%s2598_s29 + $0x2b8] sm:$0xff] %v1630_v24 }
 0x1e6   : > { %1727 = vst [vmem:[%s2598_s29 + $0x2c0] sm:$0xff] %v1631_v25 }
 0x1e8   : > { %v1065_v26 = vpop.f32.mrb[60].mxu0 }
 0x1e9   : > { %v1067_v27 = vpop.f32.mrb[61].mxu0  ;;  %v1633_v29 = vadd.f32 %v2607_v44, %v1065_v26 }
 0x1ea   : > { %v1069_v28 = vpop.f32.mrb[62].mxu0  ;;  %v1634_v31 = vadd.f32 %v2609_v47, %v1067_v27 }
 0x1eb   : > { %v1071_v30 = vpop.f32.mrb[63].mxu0  ;;  %1729 = vst [vmem:[%s2598_s29 + $0x2d0] sm:$0xff] %v1633_v29  ;;  %v1636_v32 = vadd.f32 %v2607_v44, %v1069_v28 }
 0x1ec   : > { %1730 = vst [vmem:[%s2598_s29 + $0x2d8] sm:$0xff] %v1634_v31  ;;  %v1637_v33 = vadd.f32 %v2609_v47, %v1071_v30 }
 0x1ed   : > { %1732 = vst [vmem:[%s2598_s29 + $0x2e8] sm:$0xff] %v1636_v32 }
 0x1ee   : > { %1733 = vst [vmem:[%s2598_s29 + $0x2f0] sm:$0xff] %v1637_v33 }
 0x1ef   : > { %2261 = shalt.err (!%p2258_p0)
}
 0x1f0   : > { %s2262_s8 = scalar_lea.hbm %s2794_s6, 12288  ;;  %s2266_s23 = scalar_lea.hbm %s2854_s3, 24576 }
 0x1f1   : > { %p2263_p4 = scmp.ne.s32.totalorder %s2794_s6, %s2262_s8  ;;  %p2267_p2 = scmp.lt.u32.totalorder %s2794_s6, %s2854_s3 }
 0x1f2   : > { %p2268_p9 = scmp.lt.u32.totalorder %s2266_s23, %s2262_s8  ;;  %p2270_p11 = scmp.lt.u32.totalorder %s2262_s8, %s2794_s6 }
 0x1f3   : > { %p2264_p6 = pnand %p2263_p4, %p2876_p13 }
 0x1f4   : > { %p2269_p10 = por %p2268_p9, %p2267_p2 }
 0x1f5   : > { %p2265_p12 = pneg %p2264_p6 }
 0x1f6   : > { %p2271_p5 = por %p2270_p11, %p2269_p10 }
 0x1f8   : > { %p2272_p1 = pnand %p2271_p5, %p2265_p12 }
 0x1fa   : > { %2275 = shalt.err (!%p2272_p1)
}
 0x1fb   : > { %s2344_s29 = smov 384   ;;  %s2345_s27 = smov 768  }
 0x1fc   : > { %s2346_s28 = smov 24  }
 0x1fd   : > { %2050 = dma.vmem_to_hbm [thread:$0]  (%p2876_p13), %s2798_s19, 12288, %s2794_s6, %s1736_s15, %s2344_s29, %s2345_s27, %s2346_s28  }
 0x1fe PF: > { %s1767_s22 = sand.u32 1, %s2314_s12   ;;  %p2877_p3 = scmp.ne.s32.totalorder %s2865_s25, 0 }
 0x1ff   : > { %p2878_p7 = scmp.ge.s32.totalorder %s2334_s17, 2  ;;  %s1768_s7 = scalar_lea.sflag [#allocation4], %s1767_s22 }
 0x201   : > { %p2061_p8 = pnand %p2878_p7, %p2877_p3 }
 0x203   : > { %2309 = dma.done.wait (!%p2061_p8), %s1768_s7, 12288  }
 0x204   : > { %2311 = vsyncadd (!%p2061_p8), %s1768_s7, 4294955008  ;;  %s20_s17 = sadd.s32 1, %s2334_s17   ;;  %s2879_s12 = smov %s2318_s13 }
 0x205   : > { %p17_p0 = scmp.ge.s32.totalorder %s20_s17, 4   ;;  %s2880_s13 = smov %s2322_s14 }
 0x206   : > { %s2881_s14 = smov %s2493_s5  ;;  %s2882_s15 = smov %s2330_s16 }
 0x207   : > { %s2883_s16 = smov %s2885_s4  ;;  %19 = sbr.rel (!%p17_p0) target bundleno = 7 (0x7), region = 94 }
 0x20e   :  { %1773 = vsyncpa [#allocation3], 1 }
 0x20f   :  { %1775 = vsyncpa [#allocation3 + $0x1], 1 }
 0x210   :  { %1776 = vsyncpa [#allocation6], 1 }
 0x211   :  { %1778 = vsyncpa [#allocation6 + $0x1], 1 }
 0x212   :  { %1779 = vsyncpa [#allocation4], 1 }
 0x213   :  { %1781 = vsyncpa [#allocation4 + $0x1], 1 }

</bundles_post_ra>
